<compile_context>
chip_gen: v7x
topology: tpu7x:2x2x1
jax: 0.10.0
libtpu: 0.0.40
codegen_flags: <defaults>
</compile_context>

<pallas_src>
import math
import functools

import jax
import jax.numpy as jnp
from jax.experimental import pallas as pl
from jax.experimental.pallas import tpu as pltpu


# ----------------------------------------------------------------------------
# Kernel 1: fused 1x1 conv (channel matmul) + GroupNorm for ALL projections.
# Grid = (U // units_per_block,), 3 units per block, whole batch per block.
#   x      : [U, Cmax, B*Smax]   bf16, zero-padded beyond Cin / S_u
#   wT     : [U, Cout, Cmax]     bf16, = W^T zero-padded beyond Cin
#   params : [U, Cout, 4]        columns = (bias, gamma, beta, 1/S_u)
#   mask   : [U, 1, B*Smax]      1.0 on valid spatial positions
#   out    : [U, Cout, B*Smax]   bf16 (garbage beyond S_u, sliced in wrapper)
# Only group-size-1 GroupNorm (num_groups == hidden_dim) is implemented.
# ----------------------------------------------------------------------------
def _proj_gn_kernel(x_ref, wt_ref, p_ref, m_ref, o_ref, *,
                    units_per_block, batch, smax, eps):
    for uu in range(units_per_block):          # static unroll (3 units)
        w_t = wt_ref[uu]                       # (Cout, Cmax) bf16
        x = x_ref[uu]                          # (Cmax, B*Smax) bf16
        m = m_ref[uu]                          # (1, B*Smax)   f32
        bias = p_ref[uu, :, 0:1]               # (Cout, 1)
        gamma = p_ref[uu, :, 1:2]
        beta = p_ref[uu, :, 2:3]
        inv_n = p_ref[uu, :, 3:4]              # 1 / num_valid_positions

        # Single MXU op for the whole batch (lane-concatenated batches).
        y = jnp.dot(w_t, x, preferred_element_type=jnp.float32) + bias
        ym = y * m                             # zero the padded spatial tail

        for bi in range(batch):                # static unroll (B=2)
            lo = bi * smax
            seg = ym[:, lo:lo + smax]          # (Cout, Smax) valid-masked
            # single-pass stats over valid lanes
            s1 = jnp.sum(seg, axis=1, keepdims=True)
            s2 = jnp.sum(seg * seg, axis=1, keepdims=True)
            mean = s1 * inv_n
            var = s2 * inv_n - mean * mean
            scale = gamma * jax.lax.rsqrt(var + eps)   # fold gamma into scale
            yseg = y[:, lo:lo + smax]
            o_ref[uu, :, lo:lo + smax] = (
                (yseg - mean) * scale + beta).astype(o_ref.dtype)


def fused_proj_groupnorm(x, w_t, params, mask, *, batch, smax,
                         units_per_block=3, eps=1e-5):
    """x:[U,Cmax,B*Smax] bf16, w_t:[U,Cout,Cmax] bf16, params:[U,Cout,4] f32,
    mask:[U,1,B*Smax] f32 -> [U,Cout,B*Smax] bf16."""
    U, Cmax, BS = x.shape
    Cout = w_t.shape[1]
    assert U % units_per_block == 0
    n_blocks = U // units_per_block
    kern = functools.partial(_proj_gn_kernel, units_per_block=units_per_block,
                             batch=batch, smax=smax, eps=eps)
    return pl.pallas_call(
        kern,
        out_shape=jax.ShapeDtypeStruct((U, Cout, BS), jnp.bfloat16),
        grid=(n_blocks,),
        in_specs=[
            pl.BlockSpec((units_per_block, Cmax, BS), lambda u: (u, 0, 0)),
            pl.BlockSpec((units_per_block, Cout, Cmax), lambda u: (u, 0, 0)),
            pl.BlockSpec((units_per_block, Cout, 4), lambda u: (u, 0, 0)),
            pl.BlockSpec((units_per_block, 1, BS), lambda u: (u, 0, 0)),
        ],
        out_specs=pl.BlockSpec((units_per_block, Cout, BS), lambda u: (u, 0, 0)),
        compiler_params=pltpu.CompilerParams(
            dimension_semantics=("parallel",)),
    )(x, w_t, params, mask)


# ----------------------------------------------------------------------------
# Kernel 2: detection head, all decoder levels flattened into one block.
#   hs     : [N, D]     bf16, N = L * B * Q
#   refpad : [N, 128]   f32, inverse_sigmoid(reference) at cols C:C+2, else 0
#   wmlp   : [2, D, D]  bf16, bbox MLP hidden layers;  bmlp : [2, D] f32
#   wcat   : [2D, 128]  bf16, rows 0:D = class W (cols 0:C),
#                             rows D:2D = bbox W3 (cols C:C+4)
#   bhead  : [1, 128]   f32, class bias at cols 0:C, bbox b3 at cols C:C+4
#   out    : [N, 128]   f32, cols 0:C logits, cols C:C+4 sigmoid boxes
# ----------------------------------------------------------------------------
def _head_kernel(hs_ref, ref_ref, wmlp_ref, bmlp_ref, wcat_ref, bhead_ref,
                 o_ref, *, num_classes):
    x = hs_ref[...]                                                   # (N, D) bf16
    h = jnp.maximum(
        jnp.dot(x, wmlp_ref[0], preferred_element_type=jnp.float32)
        + bmlp_ref[0:1, :], 0.0)
    h = jnp.maximum(
        jnp.dot(h.astype(x.dtype), wmlp_ref[1],
                preferred_element_type=jnp.float32)
        + bmlp_ref[1:2, :], 0.0)
    # Merge class projection (from x) and bbox last layer (from h) into one dot.
    cat = jnp.concatenate([x.astype(jnp.float32), h], axis=1).astype(x.dtype)
    pre = (jnp.dot(cat, wcat_ref[...], preferred_element_type=jnp.float32)
           + bhead_ref[...] + ref_ref[...])                           # (N, 128)
    col = jax.lax.broadcasted_iota(jnp.int32, pre.shape, 1)
    is_box = (col >= num_classes) & (col < num_classes + 4)
    o_ref[...] = jnp.where(is_box, jax.nn.sigmoid(pre), pre)


def detection_head(hs_flat, refpad, wmlp, bmlp, wcat, bhead, num_classes):
    N, D = hs_flat.shape
    OUT = bhead.shape[1]
    kern = functools.partial(_head_kernel, num_classes=num_classes)
    # TODO(synk): at production N (L*B*Q in the thousands) tile N over a
    # "parallel" grid; at N=48 one block is cheapest.
    return pl.pallas_call(
        kern,
        out_shape=jax.ShapeDtypeStruct((N, OUT), jnp.float32),
        grid=(1,),
        in_specs=[
            pl.BlockSpec((N, D), lambda i: (0, 0)),
            pl.BlockSpec((N, OUT), lambda i: (0, 0)),
            pl.BlockSpec((2, D, D), lambda i: (0, 0, 0)),
            pl.BlockSpec((2, D), lambda i: (0, 0)),
            pl.BlockSpec((2 * D, OUT), lambda i: (0, 0)),
            pl.BlockSpec((1, OUT), lambda i: (0, 0)),
        ],
        out_specs=pl.BlockSpec((N, OUT), lambda i: (0, 0)),
        compiler_params=pltpu.CompilerParams(
            dimension_semantics=("arbitrary",)),
    )(hs_flat, refpad, wmlp, bmlp, wcat, bhead)


# ----------------------------------------------------------------------------
# Plain-JAX glue
# ----------------------------------------------------------------------------
def interpolate_nearest_mask(mask, size):
    """F.interpolate(mask[None].float(), size=size) nearest -> bool, [B,h,w]."""
    B, H, W = mask.shape
    oh, ow = size
    ridx = (jnp.arange(oh) * H) // oh
    cidx = (jnp.arange(ow) * W) // ow
    return mask[:, ridx][:, :, cidx]


def inverse_sigmoid(x, eps=1e-5):
    x = jnp.clip(x, 0.0, 1.0)
    x1 = jnp.maximum(x, eps)
    x2 = jnp.maximum(1.0 - x, eps)
    return jnp.log(x1 / x2)


def make_detector_forward(cfg, consts):
    """Return a jitted Detector forward closing over packed constant slabs."""
    B = cfg["B"]
    hidden_dim = cfg["hidden_dim"]
    num_classes = cfg["num_classes"]
    Q = cfg["Q"]
    L = cfg["L"]
    spatial = cfg["spatial"]
    Cmax = cfg["Cmax"]
    Smax = cfg["Smax"]
    OUT = cfg["OUT"]

    @jax.jit
    def forward(features, det_tgt, det_pos, mask, init_reference,
                inter_references):
        # ---- pack projection inputs as [U, Cin->Cmax, B*S->B*Smax] ----------
        unit_x = [jnp.transpose(f.reshape(B, f.shape[1], -1), (1, 0, 2))
                  for f in features]
        unit_x.append(jnp.transpose(det_tgt, (1, 0, 2)))   # [64, B, Q]
        unit_x.append(jnp.transpose(det_pos, (1, 0, 2)))   # [32, B, Q]
        X = jnp.stack([
            jnp.pad(xu, ((0, Cmax - xu.shape[0]), (0, 0),
                         (0, Smax - xu.shape[2])))
            for xu in unit_x
        ]).reshape(len(unit_x), Cmax, B * Smax).astype(jnp.bfloat16)

        # ---- fused conv1x1 + GroupNorm for all 6 projection units -----------
        proj = fused_proj_groupnorm(X, consts["WT"], consts["P"], consts["M"],
                                    batch=B, smax=Smax)      # [U, D, B*Smax] bf16
        projr = proj.reshape(len(unit_x), hidden_dim, B, Smax)

        srcs, masks = [], []
        for l, s in enumerate(spatial):
            srcs.append(jnp.transpose(projr[l, :, :, :s * s], (1, 0, 2))
                        .reshape(B, hidden_dim, s, s).astype(jnp.float32))
            masks.append(interpolate_nearest_mask(mask, (s, s)))
        det_tgt_p = jnp.transpose(projr[4, :, :, :Q], (1, 2, 0)).astype(jnp.float32)
        det_pos_p = jnp.transpose(projr[5, :, :, :Q], (1, 2, 0)).astype(jnp.float32)

        # ---- transformer (external module, stubbed) -------------------------
        # TODO(synk): neck-free deformable decoder not translatable here;
        # deterministic hs of the expected shape (srcs/masks would feed it).
        hs = jnp.stack([det_tgt_p + 0.1 * (l + 1) * det_pos_p
                        for l in range(L)])                     # [L, B, Q, D]
        references = jnp.concatenate([init_reference[None], inter_references],
                                     axis=0)                    # [L, B, Q, 2]
        inv_ref = inverse_sigmoid(references)

        # ---- detection head (single lane-dense block over all tokens) -------
        N = L * B * Q
        hs_flat = hs.reshape(N, hidden_dim).astype(jnp.bfloat16)
        refpad = jnp.pad(inv_ref.reshape(N, 2),
                         ((0, 0), (num_classes, OUT - num_classes - 2)))
        head_out = detection_head(hs_flat, refpad, consts["Wmlp"],
                                  consts["bmlp"], consts["Wcat"],
                                  consts["bhead"], num_classes)
        outputs_class = head_out[:, :num_classes].reshape(L, B, Q, num_classes)
        outputs_coord = head_out[:, num_classes:num_classes + 4].reshape(L, B, Q, 4)
        out = {"pred_logits": outputs_class[-1],
               "pred_boxes": outputs_coord[-1]}
        return out, srcs, masks

    return forward


if __name__ == "__main__":
    # ---- configuration (small, consistent with the module) ----
    B = 2                    # batch
    hidden_dim = 32          # transformer.d_model (== num_groups -> group size 1)
    num_classes = 8
    Q = 8                    # num_queries (det tokens)
    L = 3                    # decoder layers -> hs.shape[0]
    num_channels = [16, 32, 64, 128]   # backbone.num_channels
    spatial = [16, 8, 4, 2]            # per-level feature map sizes
    H = W = 32                         # image-level mask size
    num_groups = 32
    assert hidden_dim == num_groups    # TODO(synk): gs>1 GroupNorm not implemented

    key = jax.random.PRNGKey(0)
    keys = iter(jax.random.split(key, 32))

    def xavier(k, cin, cout):
        a = math.sqrt(6.0 / (cin + cout))
        return jax.random.uniform(k, (cin, cout), jnp.float32, -a, a)

    # ---- parameters (deterministic, per __init__) ----
    # 6 projection units: 4 input_proj levels, tgt_proj, query_pos_proj.
    proj_cin = num_channels + [num_channels[-2], hidden_dim]   # [16,32,64,128,64,32]
    proj_w = [xavier(next(keys), c, hidden_dim) for c in proj_cin]
    # conv bias = 0, GroupNorm gamma = 1, beta = 0 for all projections.

    prior_prob = 0.01
    bias_value = -math.log((1 - prior_prob) / prior_prob)
    Wc = xavier(next(keys), hidden_dim, num_classes)
    W1 = xavier(next(keys), hidden_dim, hidden_dim)
    W2 = xavier(next(keys), hidden_dim, hidden_dim)
    W3 = jnp.zeros((hidden_dim, 4), jnp.float32)           # last-layer weight = 0
    b1 = jnp.zeros((hidden_dim,), jnp.float32)
    b2 = jnp.zeros((hidden_dim,), jnp.float32)
    b3 = jnp.array([0.0, 0.0, -2.0, -2.0], jnp.float32)    # bias[2:] = -2

    # ---- constant slab packing (ONCE, hoisted out of the per-call path) ----
    unit_S = [s * s for s in spatial] + [Q, Q]
    U = len(unit_S)
    Cmax = max(proj_cin)       # 128
    Smax = max(unit_S)         # 256
    OUT = 128

    WT = jnp.zeros((U, hidden_dim, Cmax), jnp.float32)
    P = jnp.zeros((U, hidden_dim, 4), jnp.float32)
    M = jnp.zeros((U, 1, B * Smax), jnp.float32)
    for u in range(U):
        cin, s_u = proj_cin[u], unit_S[u]
        WT = WT.at[u, :, :cin].set(proj_w[u].T)
        P = P.at[u, :, 1].set(1.0)            # GN gamma (conv bias / beta stay 0)
        P = P.at[u, :, 3].set(1.0 / s_u)      # 1 / num valid positions
        for bi in range(B):
            M = M.at[u, 0, bi * Smax:bi * Smax + s_u].set(1.0)
    WT = WT.astype(jnp.bfloat16)

    Wmlp = jnp.stack([W1, W2]).astype(jnp.bfloat16)             # [2, D, D]
    bmlp = jnp.stack([b1, b2])                                  # [2, D] f32
    Wcat = (jnp.zeros((2 * hidden_dim, OUT), jnp.float32)
            .at[:hidden_dim, :num_classes].set(Wc)
            .at[hidden_dim:, num_classes:num_classes + 4].set(W3)
            ).astype(jnp.bfloat16)                              # [2D, 128]
    bhead = (jnp.zeros((1, OUT), jnp.float32)
             .at[0, :num_classes].set(bias_value)
             .at[0, num_classes:num_classes + 4].set(b3))

    consts = {"WT": WT, "P": P, "M": M,
              "Wmlp": Wmlp, "bmlp": bmlp, "Wcat": Wcat, "bhead": bhead}
    cfg = {"B": B, "hidden_dim": hidden_dim, "num_classes": num_classes,
           "Q": Q, "L": L, "spatial": spatial, "Cmax": Cmax, "Smax": Smax,
           "OUT": OUT}

    # ---- backbone outputs (external module, stubbed) ----
    # TODO(synk): the Swin-with-RAM backbone has no clean single-kernel Pallas
    # equivalent; deterministic synthetic tensors of the expected shapes.
    features = [jax.random.normal(next(keys), (B, c, s, s), jnp.float32)
                for c, s in zip(num_channels, spatial)]
    det_tgt = jax.random.normal(next(keys), (B, num_channels[-2], Q), jnp.float32)
    det_pos = jax.random.normal(next(keys), (B, hidden_dim, Q), jnp.float32)
    mask = jnp.zeros((B, H, W), dtype=bool).at[:, :, W // 2:].set(True)
    init_reference = jax.random.uniform(next(keys), (B, Q, 2), jnp.float32, 0.1, 0.9)
    inter_references = jax.random.uniform(next(keys), (L - 1, B, Q, 2),
                                          jnp.float32, 0.1, 0.9)

    # ---- run the jitted Detector forward ----
    forward = make_detector_forward(cfg, consts)
    out, srcs, masks = forward(features, det_tgt, det_pos, mask,
                               init_reference, inter_references)

    jax.block_until_ready(out["pred_logits"])
    jax.block_until_ready(out["pred_boxes"])
    jax.block_until_ready(srcs[0])
    assert out["pred_logits"].shape == (B, Q, num_classes)
    assert out["pred_boxes"].shape == (B, Q, 4)
    assert srcs[0].shape == (B, hidden_dim, spatial[0], spatial[0])
    assert masks[0].shape == (B, spatial[0], spatial[0])
    assert bool(jnp.all(jnp.isfinite(out["pred_logits"])))
    assert bool(jnp.all((out["pred_boxes"] >= 0.0) & (out["pred_boxes"] <= 1.0)))
    print("KERNEL_OK")
</pallas_src>

<mosaic_0001>
module attributes {stable_mosaic.version = 11 : i64} {
  func.func @_proj_gn_kernel(%arg0: i32, %arg1: memref<3x128x512xbf16, #tpu.memory_space<vmem>>, %arg2: memref<3x32x128xbf16, #tpu.memory_space<vmem>>, %arg3: memref<3x32x4xf32, #tpu.memory_space<vmem>>, %arg4: memref<3x1x512xf32, #tpu.memory_space<vmem>>, %arg5: memref<3x32x512xbf16, #tpu.memory_space<vmem>>) attributes {dimension_semantics = [#tpu.dimension_semantics<parallel>], iteration_bounds = array<i64: 2>, scalar_prefetch = 0 : i64, scratch_operands = 0 : i64, tpu.core_type = #tpu.core_type<tc>, window_params = [{transform_indices = @transform_0, window_bounds = array<i64: 3, 128, 512>}, {transform_indices = @transform_1, window_bounds = array<i64: 3, 32, 128>}, {transform_indices = @transform_2, window_bounds = array<i64: 3, 32, 4>}, {transform_indices = @transform_3, window_bounds = array<i64: 3, 1, 512>}, {transform_indices = @transform_4, window_bounds = array<i64: 3, 32, 512>}]} {
    %c0 = arith.constant 0 : index
    %c0_0 = arith.constant 0 : index
    %c0_1 = arith.constant 0 : index
    %0 = vector.load %arg2[%c0, %c0_0, %c0_1] : memref<3x32x128xbf16, #tpu.memory_space<vmem>>, vector<1x32x128xbf16>
    %1 = vector.shape_cast %0 : vector<1x32x128xbf16> to vector<32x128xbf16>
    %c0_2 = arith.constant 0 : index
    %c0_3 = arith.constant 0 : index
    %c0_4 = arith.constant 0 : index
    %2 = vector.load %arg1[%c0_2, %c0_3, %c0_4] : memref<3x128x512xbf16, #tpu.memory_space<vmem>>, vector<1x128x512xbf16>
    %3 = vector.shape_cast %2 : vector<1x128x512xbf16> to vector<128x512xbf16>
    %c0_5 = arith.constant 0 : index
    %c0_6 = arith.constant 0 : index
    %c0_7 = arith.constant 0 : index
    %4 = vector.load %arg4[%c0_5, %c0_6, %c0_7] : memref<3x1x512xf32, #tpu.memory_space<vmem>>, vector<1x1x512xf32>
    %5 = vector.shape_cast %4 : vector<1x1x512xf32> to vector<1x512xf32>
    %c0_8 = arith.constant 0 : index
    %c0_9 = arith.constant 0 : index
    %c0_10 = arith.constant 0 : index
    %6 = vector.load %arg3[%c0_8, %c0_9, %c0_10] : memref<3x32x4xf32, #tpu.memory_space<vmem>>, vector<1x32x1xf32>
    %7 = vector.shape_cast %6 : vector<1x32x1xf32> to vector<32x1xf32>
    %c0_11 = arith.constant 0 : index
    %c0_12 = arith.constant 0 : index
    %c1 = arith.constant 1 : index
    %8 = vector.load %arg3[%c0_11, %c0_12, %c1] : memref<3x32x4xf32, #tpu.memory_space<vmem>>, vector<1x32x1xf32>
    %9 = vector.shape_cast %8 : vector<1x32x1xf32> to vector<32x1xf32>
    %c0_13 = arith.constant 0 : index
    %c0_14 = arith.constant 0 : index
    %c2 = arith.constant 2 : index
    %10 = vector.load %arg3[%c0_13, %c0_14, %c2] : memref<3x32x4xf32, #tpu.memory_space<vmem>>, vector<1x32x1xf32>
    %11 = vector.shape_cast %10 : vector<1x32x1xf32> to vector<32x1xf32>
    %c0_15 = arith.constant 0 : index
    %c0_16 = arith.constant 0 : index
    %c3 = arith.constant 3 : index
    %12 = vector.load %arg3[%c0_15, %c0_16, %c3] : memref<3x32x4xf32, #tpu.memory_space<vmem>>, vector<1x32x1xf32>
    %13 = vector.shape_cast %12 : vector<1x32x1xf32> to vector<32x1xf32>
    %cst = arith.constant dense<0.000000e+00> : vector<32x512xf32>
    %14 = tpu.matmul %1, %3, %cst {dimension_numbers = #tpu.dot_dimension_numbers<[1], [0], [0], [1], [0, 0, 1, 1], [], []>} : vector<32x128xbf16>, vector<128x512xbf16>, vector<32x512xf32> -> vector<32x512xf32>
    %15 = vector.broadcast %7 : vector<32x1xf32> to vector<32x512xf32>
    %16 = arith.addf %14, %15 : vector<32x512xf32>
    %17 = vector.broadcast %5 : vector<1x512xf32> to vector<32x512xf32>
    %18 = arith.mulf %16, %17 : vector<32x512xf32>
    %19 = vector.extract_strided_slice %18 {offsets = [0, 0], sizes = [32, 256], strides = [1, 1]} : vector<32x512xf32> to vector<32x256xf32>
    %cst_17 = arith.constant dense<0.000000e+00> : vector<32xf32>
    %20 = vector.multi_reduction <add>, %19, %cst_17 [1] : vector<32x256xf32> to vector<32xf32>
    %21 = vector.shape_cast %20 : vector<32xf32> to vector<32x1xf32>
    %22 = arith.mulf %19, %19 : vector<32x256xf32>
    %cst_18 = arith.constant dense<0.000000e+00> : vector<32xf32>
    %23 = vector.multi_reduction <add>, %22, %cst_18 [1] : vector<32x256xf32> to vector<32xf32>
    %24 = vector.shape_cast %23 : vector<32xf32> to vector<32x1xf32>
    %25 = arith.mulf %21, %13 : vector<32x1xf32>
    %26 = arith.mulf %24, %13 : vector<32x1xf32>
    %27 = arith.mulf %25, %25 : vector<32x1xf32>
    %28 = arith.subf %26, %27 : vector<32x1xf32>
    %cst_19 = arith.constant 9.99999974E-6 : f32
    %29 = vector.broadcast %cst_19 : f32 to vector<32x1xf32>
    %30 = arith.addf %28, %29 : vector<32x1xf32>
    %31 = math.rsqrt %30 : vector<32x1xf32>
    %32 = arith.mulf %9, %31 : vector<32x1xf32>
    %33 = vector.extract_strided_slice %16 {offsets = [0, 0], sizes = [32, 256], strides = [1, 1]} : vector<32x512xf32> to vector<32x256xf32>
    %34 = vector.broadcast %25 : vector<32x1xf32> to vector<32x256xf32>
    %35 = arith.subf %33, %34 : vector<32x256xf32>
    %36 = vector.broadcast %32 : vector<32x1xf32> to vector<32x256xf32>
    %37 = arith.mulf %35, %36 : vector<32x256xf32>
    %38 = vector.broadcast %11 : vector<32x1xf32> to vector<32x256xf32>
    %39 = arith.addf %37, %38 : vector<32x256xf32>
    %40 = arith.truncf %39 : vector<32x256xf32> to vector<32x256xbf16>
    %c0_20 = arith.constant 0 : index
    %c0_21 = arith.constant 0 : index
    %c0_22 = arith.constant 0 : index
    %41 = vector.load %arg5[%c0_20, %c0_21, %c0_22] : memref<3x32x512xbf16, #tpu.memory_space<vmem>>, vector<1x32x256xbf16>
    %42 = vector.shape_cast %41 : vector<1x32x256xbf16> to vector<32x256xbf16>
    %43 = vector.shape_cast %40 : vector<32x256xbf16> to vector<1x32x256xbf16>
    tpu.vector_store %arg5[%c0_20, %c0_21, %c0_22], %43 {strides = array<i32>} : memref<3x32x512xbf16, #tpu.memory_space<vmem>>, vector<1x32x256xbf16>,
    %44 = vector.extract_strided_slice %18 {offsets = [0, 256], sizes = [32, 256], strides = [1, 1]} : vector<32x512xf32> to vector<32x256xf32>
    %cst_23 = arith.constant dense<0.000000e+00> : vector<32xf32>
    %45 = vector.multi_reduction <add>, %44, %cst_23 [1] : vector<32x256xf32> to vector<32xf32>
    %46 = vector.shape_cast %45 : vector<32xf32> to vector<32x1xf32>
    %47 = arith.mulf %44, %44 : vector<32x256xf32>
    %cst_24 = arith.constant dense<0.000000e+00> : vector<32xf32>
    %48 = vector.multi_reduction <add>, %47, %cst_24 [1] : vector<32x256xf32> to vector<32xf32>
    %49 = vector.shape_cast %48 : vector<32xf32> to vector<32x1xf32>
    %50 = arith.mulf %46, %13 : vector<32x1xf32>
    %51 = arith.mulf %49, %13 : vector<32x1xf32>
    %52 = arith.mulf %50, %50 : vector<32x1xf32>
    %53 = arith.subf %51, %52 : vector<32x1xf32>
    %cst_25 = arith.constant 9.99999974E-6 : f32
    %54 = vector.broadcast %cst_25 : f32 to vector<32x1xf32>
    %55 = arith.addf %53, %54 : vector<32x1xf32>
    %56 = math.rsqrt %55 : vector<32x1xf32>
    %57 = arith.mulf %9, %56 : vector<32x1xf32>
    %58 = vector.extract_strided_slice %16 {offsets = [0, 256], sizes = [32, 256], strides = [1, 1]} : vector<32x512xf32> to vector<32x256xf32>
    %59 = vector.broadcast %50 : vector<32x1xf32> to vector<32x256xf32>
    %60 = arith.subf %58, %59 : vector<32x256xf32>
    %61 = vector.broadcast %57 : vector<32x1xf32> to vector<32x256xf32>
    %62 = arith.mulf %60, %61 : vector<32x256xf32>
    %63 = vector.broadcast %11 : vector<32x1xf32> to vector<32x256xf32>
    %64 = arith.addf %62, %63 : vector<32x256xf32>
    %65 = arith.truncf %64 : vector<32x256xf32> to vector<32x256xbf16>
    %c0_26 = arith.constant 0 : index
    %c0_27 = arith.constant 0 : index
    %c256 = arith.constant 256 : index
    %66 = vector.load %arg5[%c0_26, %c0_27, %c256] : memref<3x32x512xbf16, #tpu.memory_space<vmem>>, vector<1x32x256xbf16>
    %67 = vector.shape_cast %66 : vector<1x32x256xbf16> to vector<32x256xbf16>
    %68 = vector.shape_cast %65 : vector<32x256xbf16> to vector<1x32x256xbf16>
    tpu.vector_store %arg5[%c0_26, %c0_27, %c256], %68 {strides = array<i32>} : memref<3x32x512xbf16, #tpu.memory_space<vmem>>, vector<1x32x256xbf16>,
    %c1_28 = arith.constant 1 : index
    %c0_29 = arith.constant 0 : index
    %c0_30 = arith.constant 0 : index
    %69 = vector.load %arg2[%c1_28, %c0_29, %c0_30] : memref<3x32x128xbf16, #tpu.memory_space<vmem>>, vector<1x32x128xbf16>
    %70 = vector.shape_cast %69 : vector<1x32x128xbf16> to vector<32x128xbf16>
    %c1_31 = arith.constant 1 : index
    %c0_32 = arith.constant 0 : index
    %c0_33 = arith.constant 0 : index
    %71 = vector.load %arg1[%c1_31, %c0_32, %c0_33] : memref<3x128x512xbf16, #tpu.memory_space<vmem>>, vector<1x128x512xbf16>
    %72 = vector.shape_cast %71 : vector<1x128x512xbf16> to vector<128x512xbf16>
    %c1_34 = arith.constant 1 : index
    %c0_35 = arith.constant 0 : index
    %c0_36 = arith.constant 0 : index
    %73 = vector.load %arg4[%c1_34, %c0_35, %c0_36] : memref<3x1x512xf32, #tpu.memory_space<vmem>>, vector<1x1x512xf32>
    %74 = vector.shape_cast %73 : vector<1x1x512xf32> to vector<1x512xf32>
    %c1_37 = arith.constant 1 : index
    %c0_38 = arith.constant 0 : index
    %c0_39 = arith.constant 0 : index
    %75 = vector.load %arg3[%c1_37, %c0_38, %c0_39] : memref<3x32x4xf32, #tpu.memory_space<vmem>>, vector<1x32x1xf32>
    %76 = vector.shape_cast %75 : vector<1x32x1xf32> to vector<32x1xf32>
    %c1_40 = arith.constant 1 : index
    %c0_41 = arith.constant 0 : index
    %c1_42 = arith.constant 1 : index
    %77 = vector.load %arg3[%c1_40, %c0_41, %c1_42] : memref<3x32x4xf32, #tpu.memory_space<vmem>>, vector<1x32x1xf32>
    %78 = vector.shape_cast %77 : vector<1x32x1xf32> to vector<32x1xf32>
    %c1_43 = arith.constant 1 : index
    %c0_44 = arith.constant 0 : index
    %c2_45 = arith.constant 2 : index
    %79 = vector.load %arg3[%c1_43, %c0_44, %c2_45] : memref<3x32x4xf32, #tpu.memory_space<vmem>>, vector<1x32x1xf32>
    %80 = vector.shape_cast %79 : vector<1x32x1xf32> to vector<32x1xf32>
    %c1_46 = arith.constant 1 : index
    %c0_47 = arith.constant 0 : index
    %c3_48 = arith.constant 3 : index
    %81 = vector.load %arg3[%c1_46, %c0_47, %c3_48] : memref<3x32x4xf32, #tpu.memory_space<vmem>>, vector<1x32x1xf32>
    %82 = vector.shape_cast %81 : vector<1x32x1xf32> to vector<32x1xf32>
    %cst_49 = arith.constant dense<0.000000e+00> : vector<32x512xf32>
    %83 = tpu.matmul %70, %72, %cst_49 {dimension_numbers = #tpu.dot_dimension_numbers<[1], [0], [0], [1], [0, 0, 1, 1], [], []>} : vector<32x128xbf16>, vector<128x512xbf16>, vector<32x512xf32> -> vector<32x512xf32>
    %84 = vector.broadcast %76 : vector<32x1xf32> to vector<32x512xf32>
    %85 = arith.addf %83, %84 : vector<32x512xf32>
    %86 = vector.broadcast %74 : vector<1x512xf32> to vector<32x512xf32>
    %87 = arith.mulf %85, %86 : vector<32x512xf32>
    %88 = vector.extract_strided_slice %87 {offsets = [0, 0], sizes = [32, 256], strides = [1, 1]} : vector<32x512xf32> to vector<32x256xf32>
    %cst_50 = arith.constant dense<0.000000e+00> : vector<32xf32>
    %89 = vector.multi_reduction <add>, %88, %cst_50 [1] : vector<32x256xf32> to vector<32xf32>
    %90 = vector.shape_cast %89 : vector<32xf32> to vector<32x1xf32>
    %91 = arith.mulf %88, %88 : vector<32x256xf32>
    %cst_51 = arith.constant dense<0.000000e+00> : vector<32xf32>
    %92 = vector.multi_reduction <add>, %91, %cst_51 [1] : vector<32x256xf32> to vector<32xf32>
    %93 = vector.shape_cast %92 : vector<32xf32> to vector<32x1xf32>
    %94 = arith.mulf %90, %82 : vector<32x1xf32>
    %95 = arith.mulf %93, %82 : vector<32x1xf32>
    %96 = arith.mulf %94, %94 : vector<32x1xf32>
    %97 = arith.subf %95, %96 : vector<32x1xf32>
    %cst_52 = arith.constant 9.99999974E-6 : f32
    %98 = vector.broadcast %cst_52 : f32 to vector<32x1xf32>
    %99 = arith.addf %97, %98 : vector<32x1xf32>
    %100 = math.rsqrt %99 : vector<32x1xf32>
    %101 = arith.mulf %78, %100 : vector<32x1xf32>
    %102 = vector.extract_strided_slice %85 {offsets = [0, 0], sizes = [32, 256], strides = [1, 1]} : vector<32x512xf32> to vector<32x256xf32>
    %103 = vector.broadcast %94 : vector<32x1xf32> to vector<32x256xf32>
    %104 = arith.subf %102, %103 : vector<32x256xf32>
    %105 = vector.broadcast %101 : vector<32x1xf32> to vector<32x256xf32>
    %106 = arith.mulf %104, %105 : vector<32x256xf32>
    %107 = vector.broadcast %80 : vector<32x1xf32> to vector<32x256xf32>
    %108 = arith.addf %106, %107 : vector<32x256xf32>
    %109 = arith.truncf %108 : vector<32x256xf32> to vector<32x256xbf16>
    %c1_53 = arith.constant 1 : index
    %c0_54 = arith.constant 0 : index
    %c0_55 = arith.constant 0 : index
    %110 = vector.load %arg5[%c1_53, %c0_54, %c0_55] : memref<3x32x512xbf16, #tpu.memory_space<vmem>>, vector<1x32x256xbf16>
    %111 = vector.shape_cast %110 : vector<1x32x256xbf16> to vector<32x256xbf16>
    %112 = vector.shape_cast %109 : vector<32x256xbf16> to vector<1x32x256xbf16>
    tpu.vector_store %arg5[%c1_53, %c0_54, %c0_55], %112 {strides = array<i32>} : memref<3x32x512xbf16, #tpu.memory_space<vmem>>, vector<1x32x256xbf16>,
    %113 = vector.extract_strided_slice %87 {offsets = [0, 256], sizes = [32, 256], strides = [1, 1]} : vector<32x512xf32> to vector<32x256xf32>
    %cst_56 = arith.constant dense<0.000000e+00> : vector<32xf32>
    %114 = vector.multi_reduction <add>, %113, %cst_56 [1] : vector<32x256xf32> to vector<32xf32>
    %115 = vector.shape_cast %114 : vector<32xf32> to vector<32x1xf32>
    %116 = arith.mulf %113, %113 : vector<32x256xf32>
    %cst_57 = arith.constant dense<0.000000e+00> : vector<32xf32>
    %117 = vector.multi_reduction <add>, %116, %cst_57 [1] : vector<32x256xf32> to vector<32xf32>
    %118 = vector.shape_cast %117 : vector<32xf32> to vector<32x1xf32>
    %119 = arith.mulf %115, %82 : vector<32x1xf32>
    %120 = arith.mulf %118, %82 : vector<32x1xf32>
    %121 = arith.mulf %119, %119 : vector<32x1xf32>
    %122 = arith.subf %120, %121 : vector<32x1xf32>
    %cst_58 = arith.constant 9.99999974E-6 : f32
    %123 = vector.broadcast %cst_58 : f32 to vector<32x1xf32>
    %124 = arith.addf %122, %123 : vector<32x1xf32>
    %125 = math.rsqrt %124 : vector<32x1xf32>
    %126 = arith.mulf %78, %125 : vector<32x1xf32>
    %127 = vector.extract_strided_slice %85 {offsets = [0, 256], sizes = [32, 256], strides = [1, 1]} : vector<32x512xf32> to vector<32x256xf32>
    %128 = vector.broadcast %119 : vector<32x1xf32> to vector<32x256xf32>
    %129 = arith.subf %127, %128 : vector<32x256xf32>
    %130 = vector.broadcast %126 : vector<32x1xf32> to vector<32x256xf32>
    %131 = arith.mulf %129, %130 : vector<32x256xf32>
    %132 = vector.broadcast %80 : vector<32x1xf32> to vector<32x256xf32>
    %133 = arith.addf %131, %132 : vector<32x256xf32>
    %134 = arith.truncf %133 : vector<32x256xf32> to vector<32x256xbf16>
    %c1_59 = arith.constant 1 : index
    %c0_60 = arith.constant 0 : index
    %c256_61 = arith.constant 256 : index
    %135 = vector.load %arg5[%c1_59, %c0_60, %c256_61] : memref<3x32x512xbf16, #tpu.memory_space<vmem>>, vector<1x32x256xbf16>
    %136 = vector.shape_cast %135 : vector<1x32x256xbf16> to vector<32x256xbf16>
    %137 = vector.shape_cast %134 : vector<32x256xbf16> to vector<1x32x256xbf16>
    tpu.vector_store %arg5[%c1_59, %c0_60, %c256_61], %137 {strides = array<i32>} : memref<3x32x512xbf16, #tpu.memory_space<vmem>>, vector<1x32x256xbf16>,
    %c2_62 = arith.constant 2 : index
    %c0_63 = arith.constant 0 : index
    %c0_64 = arith.constant 0 : index
    %138 = vector.load %arg2[%c2_62, %c0_63, %c0_64] : memref<3x32x128xbf16, #tpu.memory_space<vmem>>, vector<1x32x128xbf16>
    %139 = vector.shape_cast %138 : vector<1x32x128xbf16> to vector<32x128xbf16>
    %c2_65 = arith.constant 2 : index
    %c0_66 = arith.constant 0 : index
    %c0_67 = arith.constant 0 : index
    %140 = vector.load %arg1[%c2_65, %c0_66, %c0_67] : memref<3x128x512xbf16, #tpu.memory_space<vmem>>, vector<1x128x512xbf16>
    %141 = vector.shape_cast %140 : vector<1x128x512xbf16> to vector<128x512xbf16>
    %c2_68 = arith.constant 2 : index
    %c0_69 = arith.constant 0 : index
    %c0_70 = arith.constant 0 : index
    %142 = vector.load %arg4[%c2_68, %c0_69, %c0_70] : memref<3x1x512xf32, #tpu.memory_space<vmem>>, vector<1x1x512xf32>
    %143 = vector.shape_cast %142 : vector<1x1x512xf32> to vector<1x512xf32>
    %c2_71 = arith.constant 2 : index
    %c0_72 = arith.constant 0 : index
    %c0_73 = arith.constant 0 : index
    %144 = vector.load %arg3[%c2_71, %c0_72, %c0_73] : memref<3x32x4xf32, #tpu.memory_space<vmem>>, vector<1x32x1xf32>
    %145 = vector.shape_cast %144 : vector<1x32x1xf32> to vector<32x1xf32>
    %c2_74 = arith.constant 2 : index
    %c0_75 = arith.constant 0 : index
    %c1_76 = arith.constant 1 : index
    %146 = vector.load %arg3[%c2_74, %c0_75, %c1_76] : memref<3x32x4xf32, #tpu.memory_space<vmem>>, vector<1x32x1xf32>
    %147 = vector.shape_cast %146 : vector<1x32x1xf32> to vector<32x1xf32>
    %c2_77 = arith.constant 2 : index
    %c0_78 = arith.constant 0 : index
    %c2_79 = arith.constant 2 : index
    %148 = vector.load %arg3[%c2_77, %c0_78, %c2_79] : memref<3x32x4xf32, #tpu.memory_space<vmem>>, vector<1x32x1xf32>
    %149 = vector.shape_cast %148 : vector<1x32x1xf32> to vector<32x1xf32>
    %c2_80 = arith.constant 2 : index
    %c0_81 = arith.constant 0 : index
    %c3_82 = arith.constant 3 : index
    %150 = vector.load %arg3[%c2_80, %c0_81, %c3_82] : memref<3x32x4xf32, #tpu.memory_space<vmem>>, vector<1x32x1xf32>
    %151 = vector.shape_cast %150 : vector<1x32x1xf32> to vector<32x1xf32>
    %cst_83 = arith.constant dense<0.000000e+00> : vector<32x512xf32>
    %152 = tpu.matmul %139, %141, %cst_83 {dimension_numbers = #tpu.dot_dimension_numbers<[1], [0], [0], [1], [0, 0, 1, 1], [], []>} : vector<32x128xbf16>, vector<128x512xbf16>, vector<32x512xf32> -> vector<32x512xf32>
    %153 = vector.broadcast %145 : vector<32x1xf32> to vector<32x512xf32>
    %154 = arith.addf %152, %153 : vector<32x512xf32>
    %155 = vector.broadcast %143 : vector<1x512xf32> to vector<32x512xf32>
    %156 = arith.mulf %154, %155 : vector<32x512xf32>
    %157 = vector.extract_strided_slice %156 {offsets = [0, 0], sizes = [32, 256], strides = [1, 1]} : vector<32x512xf32> to vector<32x256xf32>
    %cst_84 = arith.constant dense<0.000000e+00> : vector<32xf32>
    %158 = vector.multi_reduction <add>, %157, %cst_84 [1] : vector<32x256xf32> to vector<32xf32>
    %159 = vector.shape_cast %158 : vector<32xf32> to vector<32x1xf32>
    %160 = arith.mulf %157, %157 : vector<32x256xf32>
    %cst_85 = arith.constant dense<0.000000e+00> : vector<32xf32>
    %161 = vector.multi_reduction <add>, %160, %cst_85 [1] : vector<32x256xf32> to vector<32xf32>
    %162 = vector.shape_cast %161 : vector<32xf32> to vector<32x1xf32>
    %163 = arith.mulf %159, %151 : vector<32x1xf32>
    %164 = arith.mulf %162, %151 : vector<32x1xf32>
    %165 = arith.mulf %163, %163 : vector<32x1xf32>
    %166 = arith.subf %164, %165 : vector<32x1xf32>
    %cst_86 = arith.constant 9.99999974E-6 : f32
    %167 = vector.broadcast %cst_86 : f32 to vector<32x1xf32>
    %168 = arith.addf %166, %167 : vector<32x1xf32>
    %169 = math.rsqrt %168 : vector<32x1xf32>
    %170 = arith.mulf %147, %169 : vector<32x1xf32>
    %171 = vector.extract_strided_slice %154 {offsets = [0, 0], sizes = [32, 256], strides = [1, 1]} : vector<32x512xf32> to vector<32x256xf32>
    %172 = vector.broadcast %163 : vector<32x1xf32> to vector<32x256xf32>
    %173 = arith.subf %171, %172 : vector<32x256xf32>
    %174 = vector.broadcast %170 : vector<32x1xf32> to vector<32x256xf32>
    %175 = arith.mulf %173, %174 : vector<32x256xf32>
    %176 = vector.broadcast %149 : vector<32x1xf32> to vector<32x256xf32>
    %177 = arith.addf %175, %176 : vector<32x256xf32>
    %178 = arith.truncf %177 : vector<32x256xf32> to vector<32x256xbf16>
    %c2_87 = arith.constant 2 : index
    %c0_88 = arith.constant 0 : index
    %c0_89 = arith.constant 0 : index
    %179 = vector.load %arg5[%c2_87, %c0_88, %c0_89] : memref<3x32x512xbf16, #tpu.memory_space<vmem>>, vector<1x32x256xbf16>
    %180 = vector.shape_cast %179 : vector<1x32x256xbf16> to vector<32x256xbf16>
    %181 = vector.shape_cast %178 : vector<32x256xbf16> to vector<1x32x256xbf16>
    tpu.vector_store %arg5[%c2_87, %c0_88, %c0_89], %181 {strides = array<i32>} : memref<3x32x512xbf16, #tpu.memory_space<vmem>>, vector<1x32x256xbf16>,
    %182 = vector.extract_strided_slice %156 {offsets = [0, 256], sizes = [32, 256], strides = [1, 1]} : vector<32x512xf32> to vector<32x256xf32>
    %cst_90 = arith.constant dense<0.000000e+00> : vector<32xf32>
    %183 = vector.multi_reduction <add>, %182, %cst_90 [1] : vector<32x256xf32> to vector<32xf32>
    %184 = vector.shape_cast %183 : vector<32xf32> to vector<32x1xf32>
    %185 = arith.mulf %182, %182 : vector<32x256xf32>
    %cst_91 = arith.constant dense<0.000000e+00> : vector<32xf32>
    %186 = vector.multi_reduction <add>, %185, %cst_91 [1] : vector<32x256xf32> to vector<32xf32>
    %187 = vector.shape_cast %186 : vector<32xf32> to vector<32x1xf32>
    %188 = arith.mulf %184, %151 : vector<32x1xf32>
    %189 = arith.mulf %187, %151 : vector<32x1xf32>
    %190 = arith.mulf %188, %188 : vector<32x1xf32>
    %191 = arith.subf %189, %190 : vector<32x1xf32>
    %cst_92 = arith.constant 9.99999974E-6 : f32
    %192 = vector.broadcast %cst_92 : f32 to vector<32x1xf32>
    %193 = arith.addf %191, %192 : vector<32x1xf32>
    %194 = math.rsqrt %193 : vector<32x1xf32>
    %195 = arith.mulf %147, %194 : vector<32x1xf32>
    %196 = vector.extract_strided_slice %154 {offsets = [0, 256], sizes = [32, 256], strides = [1, 1]} : vector<32x512xf32> to vector<32x256xf32>
    %197 = vector.broadcast %188 : vector<32x1xf32> to vector<32x256xf32>
    %198 = arith.subf %196, %197 : vector<32x256xf32>
    %199 = vector.broadcast %195 : vector<32x1xf32> to vector<32x256xf32>
    %200 = arith.mulf %198, %199 : vector<32x256xf32>
    %201 = vector.broadcast %149 : vector<32x1xf32> to vector<32x256xf32>
    %202 = arith.addf %200, %201 : vector<32x256xf32>
    %203 = arith.truncf %202 : vector<32x256xf32> to vector<32x256xbf16>
    %c2_93 = arith.constant 2 : index
    %c0_94 = arith.constant 0 : index
    %c256_95 = arith.constant 256 : index
    %204 = vector.load %arg5[%c2_93, %c0_94, %c256_95] : memref<3x32x512xbf16, #tpu.memory_space<vmem>>, vector<1x32x256xbf16>
    %205 = vector.shape_cast %204 : vector<1x32x256xbf16> to vector<32x256xbf16>
    %206 = vector.shape_cast %203 : vector<32x256xbf16> to vector<1x32x256xbf16>
    tpu.vector_store %arg5[%c2_93, %c0_94, %c256_95], %206 {strides = array<i32>} : memref<3x32x512xbf16, #tpu.memory_space<vmem>>, vector<1x32x256xbf16>,
    return
  }
  func.func @transform_0(%arg0: i32) -> (i32, i32, i32) {
    %c0_i32 = arith.constant 0 : i32
    %c0_i32_0 = arith.constant 0 : i32
    %c0_i32_1 = arith.constant 0 : i32
    return %arg0, %c0_i32, %c0_i32_0 : i32, i32, i32
  }
  func.func @transform_1(%arg0: i32) -> (i32, i32, i32) {
    %c0_i32 = arith.constant 0 : i32
    %c0_i32_0 = arith.constant 0 : i32
    %c0_i32_1 = arith.constant 0 : i32
    return %arg0, %c0_i32, %c0_i32_0 : i32, i32, i32
  }
  func.func @transform_2(%arg0: i32) -> (i32, i32, i32) {
    %c0_i32 = arith.constant 0 : i32
    %c0_i32_0 = arith.constant 0 : i32
    %c0_i32_1 = arith.constant 0 : i32
    return %arg0, %c0_i32, %c0_i32_0 : i32, i32, i32
  }
  func.func @transform_3(%arg0: i32) -> (i32, i32, i32) {
    %c0_i32 = arith.constant 0 : i32
    %c0_i32_0 = arith.constant 0 : i32
    %c0_i32_1 = arith.constant 0 : i32
    return %arg0, %c0_i32, %c0_i32_0 : i32, i32, i32
  }
  func.func @transform_4(%arg0: i32) -> (i32, i32, i32) {
    %c0_i32 = arith.constant 0 : i32
    %c0_i32_0 = arith.constant 0 : i32
    %c0_i32_1 = arith.constant 0 : i32
    return %arg0, %c0_i32, %c0_i32_0 : i32, i32, i32
  }
}

module attributes {stable_mosaic.version = 11 : i64} {
  func.func @_head_kernel(%arg0: i32, %arg1: memref<48x32xbf16, #tpu.memory_space<vmem>>, %arg2: memref<48x128xf32, #tpu.memory_space<vmem>>, %arg3: memref<2x32x32xbf16, #tpu.memory_space<vmem>>, %arg4: memref<2x32xf32, #tpu.memory_space<vmem>>, %arg5: memref<64x128xbf16, #tpu.memory_space<vmem>>, %arg6: memref<1x128xf32, #tpu.memory_space<vmem>>, %arg7: memref<48x128xf32, #tpu.memory_space<vmem>>) attributes {dimension_semantics = [#tpu.dimension_semantics<arbitrary>], iteration_bounds = array<i64: 1>, scalar_prefetch = 0 : i64, scratch_operands = 0 : i64, tpu.core_type = #tpu.core_type<tc>, window_params = [{pipeline_mode = #tpu.pipeline_mode<synchronous>, transform_indices = @transform_0, window_bounds = array<i64: 48, 32>}, {pipeline_mode = #tpu.pipeline_mode<synchronous>, transform_indices = @transform_1, window_bounds = array<i64: 48, 128>}, {pipeline_mode = #tpu.pipeline_mode<synchronous>, transform_indices = @transform_2, window_bounds = array<i64: 2, 32, 32>}, {pipeline_mode = #tpu.pipeline_mode<synchronous>, transform_indices = @transform_3, window_bounds = array<i64: 2, 32>}, {pipeline_mode = #tpu.pipeline_mode<synchronous>, transform_indices = @transform_4, window_bounds = array<i64: 64, 128>}, {pipeline_mode = #tpu.pipeline_mode<synchronous>, transform_indices = @transform_5, window_bounds = array<i64: 1, 128>}, {pipeline_mode = #tpu.pipeline_mode<synchronous>, transform_indices = @transform_6, window_bounds = array<i64: 48, 128>}]} {
    %c0 = arith.constant 0 : index
    %c0_0 = arith.constant 0 : index
    %0 = vector.load %arg1[%c0, %c0_0] : memref<48x32xbf16, #tpu.memory_space<vmem>>, vector<48x32xbf16>
    %c0_1 = arith.constant 0 : index
    %c0_2 = arith.constant 0 : index
    %c0_3 = arith.constant 0 : index
    %1 = vector.load %arg3[%c0_1, %c0_2, %c0_3] : memref<2x32x32xbf16, #tpu.memory_space<vmem>>, vector<1x32x32xbf16>
    %2 = vector.shape_cast %1 : vector<1x32x32xbf16> to vector<32x32xbf16>
    %cst = arith.constant dense<0.000000e+00> : vector<48x32xf32>
    %3 = tpu.matmul %0, %2, %cst {dimension_numbers = #tpu.dot_dimension_numbers<[1], [0], [0], [1], [0, 0, 1, 1], [], []>} : vector<48x32xbf16>, vector<32x32xbf16>, vector<48x32xf32> -> vector<48x32xf32>
    %c0_4 = arith.constant 0 : index
    %c0_5 = arith.constant 0 : index
    %4 = vector.load %arg4[%c0_4, %c0_5] : memref<2x32xf32, #tpu.memory_space<vmem>>, vector<1x32xf32>
    %5 = vector.broadcast %4 : vector<1x32xf32> to vector<48x32xf32>
    %6 = arith.addf %3, %5 : vector<48x32xf32>
    %cst_6 = arith.constant 0.000000e+00 : f32
    %7 = vector.broadcast %cst_6 : f32 to vector<48x32xf32>
    %8 = arith.maximumf %6, %7 : vector<48x32xf32>
    %9 = arith.truncf %8 : vector<48x32xf32> to vector<48x32xbf16>
    %c1 = arith.constant 1 : index
    %c0_7 = arith.constant 0 : index
    %c0_8 = arith.constant 0 : index
    %10 = vector.load %arg3[%c1, %c0_7, %c0_8] : memref<2x32x32xbf16, #tpu.memory_space<vmem>>, vector<1x32x32xbf16>
    %11 = vector.shape_cast %10 : vector<1x32x32xbf16> to vector<32x32xbf16>
    %cst_9 = arith.constant dense<0.000000e+00> : vector<48x32xf32>
    %12 = tpu.matmul %9, %11, %cst_9 {dimension_numbers = #tpu.dot_dimension_numbers<[1], [0], [0], [1], [0, 0, 1, 1], [], []>} : vector<48x32xbf16>, vector<32x32xbf16>, vector<48x32xf32> -> vector<48x32xf32>
    %c1_10 = arith.constant 1 : index
    %c0_11 = arith.constant 0 : index
    %13 = vector.load %arg4[%c1_10, %c0_11] : memref<2x32xf32, #tpu.memory_space<vmem>>, vector<1x32xf32>
    %14 = vector.broadcast %13 : vector<1x32xf32> to vector<48x32xf32>
    %15 = arith.addf %12, %14 : vector<48x32xf32>
    %cst_12 = arith.constant 0.000000e+00 : f32
    %16 = vector.broadcast %cst_12 : f32 to vector<48x32xf32>
    %17 = arith.maximumf %15, %16 : vector<48x32xf32>
    %18 = arith.extf %0 : vector<48x32xbf16> to vector<48x32xf32>
    %19 = tpu.concatenate %18, %17 in 1 : vector<48x32xf32>, vector<48x32xf32> -> vector<48x64xf32>
    %20 = arith.truncf %19 : vector<48x64xf32> to vector<48x64xbf16>
    %c0_13 = arith.constant 0 : index
    %c0_14 = arith.constant 0 : index
    %21 = vector.load %arg5[%c0_13, %c0_14] : memref<64x128xbf16, #tpu.memory_space<vmem>>, vector<64x128xbf16>
    %cst_15 = arith.constant dense<0.000000e+00> : vector<48x128xf32>
    %22 = tpu.matmul %20, %21, %cst_15 {dimension_numbers = #tpu.dot_dimension_numbers<[1], [0], [0], [1], [0, 0, 1, 1], [], []>} : vector<48x64xbf16>, vector<64x128xbf16>, vector<48x128xf32> -> vector<48x128xf32>
    %c0_16 = arith.constant 0 : index
    %c0_17 = arith.constant 0 : index
    %23 = vector.load %arg6[%c0_16, %c0_17] : memref<1x128xf32, #tpu.memory_space<vmem>>, vector<1x128xf32>
    %24 = vector.broadcast %23 : vector<1x128xf32> to vector<48x128xf32>
    %25 = arith.addf %22, %24 : vector<48x128xf32>
    %c0_18 = arith.constant 0 : index
    %c0_19 = arith.constant 0 : index
    %26 = vector.load %arg2[%c0_18, %c0_19] : memref<48x128xf32, #tpu.memory_space<vmem>>, vector<48x128xf32>
    %27 = arith.addf %25, %26 : vector<48x128xf32>
    %28 = tpu.iota {dimensions = array<i32: 1>} : vector<48x128xi32>
    %c8_i32 = arith.constant 8 : i32
    %29 = vector.broadcast %c8_i32 : i32 to vector<48x128xi32>
    %30 = arith.cmpi sge, %28, %29 : vector<48x128xi32>
    %c12_i32 = arith.constant 12 : i32
    %31 = vector.broadcast %c12_i32 : i32 to vector<48x128xi32>
    %32 = arith.cmpi slt, %28, %31 : vector<48x128xi32>
    %33 = arith.andi %30, %32 : vector<48x128xi1>
    %34 = arith.negf %27 : vector<48x128xf32>
    %35 = math.exp %34 : vector<48x128xf32>
    %cst_20 = arith.constant 1.000000e+00 : f32
    %36 = vector.broadcast %cst_20 : f32 to vector<48x128xf32>
    %37 = arith.addf %36, %35 : vector<48x128xf32>
    %38 = arith.divf %36, %37 : vector<48x128xf32>
    %39 = arith.select %33, %38, %27 : vector<48x128xi1>, vector<48x128xf32>
    %c0_21 = arith.constant 0 : index
    %c0_22 = arith.constant 0 : index
    %40 = vector.load %arg7[%c0_21, %c0_22] : memref<48x128xf32, #tpu.memory_space<vmem>>, vector<48x128xf32>
    tpu.vector_store %arg7[%c0_21, %c0_22], %39 {strides = array<i32>} : memref<48x128xf32, #tpu.memory_space<vmem>>, vector<48x128xf32>,
    return
  }
  func.func @transform_0(%arg0: i32) -> (i32, i32) {
    %c0_i32 = arith.constant 0 : i32
    %c0_i32_0 = arith.constant 0 : i32
    %c0_i32_1 = arith.constant 0 : i32
    return %c0_i32, %c0_i32_0 : i32, i32
  }
  func.func @transform_1(%arg0: i32) -> (i32, i32) {
    %c0_i32 = arith.constant 0 : i32
    %c0_i32_0 = arith.constant 0 : i32
    %c0_i32_1 = arith.constant 0 : i32
    return %c0_i32, %c0_i32_0 : i32, i32
  }
  func.func @transform_2(%arg0: i32) -> (i32, i32, i32) {
    %c0_i32 = arith.constant 0 : i32
    %c0_i32_0 = arith.constant 0 : i32
    %c0_i32_1 = arith.constant 0 : i32
    %c0_i32_2 = arith.constant 0 : i32
    return %c0_i32, %c0_i32_0, %c0_i32_1 : i32, i32, i32
  }
  func.func @transform_3(%arg0: i32) -> (i32, i32) {
    %c0_i32 = arith.constant 0 : i32
    %c0_i32_0 = arith.constant 0 : i32
    %c0_i32_1 = arith.constant 0 : i32
    return %c0_i32, %c0_i32_0 : i32, i32
  }
  func.func @transform_4(%arg0: i32) -> (i32, i32) {
    %c0_i32 = arith.constant 0 : i32
    %c0_i32_0 = arith.constant 0 : i32
    %c0_i32_1 = arith.constant 0 : i32
    return %c0_i32, %c0_i32_0 : i32, i32
  }
  func.func @transform_5(%arg0: i32) -> (i32, i32) {
    %c0_i32 = arith.constant 0 : i32
    %c0_i32_0 = arith.constant 0 : i32
    %c0_i32_1 = arith.constant 0 : i32
    return %c0_i32, %c0_i32_0 : i32, i32
  }
  func.func @transform_6(%arg0: i32) -> (i32, i32) {
    %c0_i32 = arith.constant 0 : i32
    %c0_i32_0 = arith.constant 0 : i32
    %c0_i32_1 = arith.constant 0 : i32
    return %c0_i32, %c0_i32_0 : i32, i32
  }
}

</mosaic_0001>

<bundles_post_ra>
// kernel: forward.3
= control target key start
LH: loop header
LB: loop body
LE: loop exit
PB: predicated region body
PF: predicated region fallthrough
CT: control target
= control target key end

     0   :  { %v612_v0 = vmov 0.0   ;;  %vm613_vm0 = vmmov 0   ;;  %vm66_vm1 = vcmask 261120   ;;  %s614_s21 = smov 32   ;;  %vm314_vm2 = vcmask 523264   ;;  %s802_s2 = inlined_call_operand.vmem [shape: bf16[2,32,32], index: 2, kind: input, shape index: {}]   ;;  %s803_s0 = inlined_call_operand.vmem [shape: bf16[48,32], index: 0, kind: input, shape index: {}]   ;;  %s804_s3 = inlined_call_operand.vmem [shape: f32[2,32], index: 3, kind: input, shape index: {}]   ;;  %s805_s4 = inlined_call_operand.vmem [shape: bf16[64,128], index: 4, kind: input, shape index: {}]   ;;  %s806_s5 = inlined_call_operand.vmem [shape: f32[1,128], index: 5, kind: input, shape index: {}]   ;;  %s807_s1 = inlined_call_operand.vmem [shape: f32[48,128], index: 1, kind: input, shape index: {}]   ;;  %s808_s6 = inlined_call_operand.vmem [shape: f32[48,128], index: 6, kind: output, shape index: {}]  }
   0x1   :  { %500 = vmatprep.subr.bf16.mxu0 %v612_v0  ;;  %v574_v1 = vld [vmem:[%s802_s2] sm:$0xff]   ;;  %504 = vmatprep.mubr.msk.bf16.mxu0 %vm613_vm0, %v612_v0  ;;  %v575_v2 = vld [vmem:[%s802_s2 + $0x8] sm:$0xff]   ;;  %v670_v4 = vld [vmem:[%s803_s0 + $0x10] sm:$0xff]  }
   0x2   :  { %552 = vmatprep.subr.bf16.mxu1 %v612_v0  ;;  %512 = vmatprep.mubr.msk.bf16.mxu1 %vm613_vm0, %v612_v0  ;;  %v665_v3 = vld [vmem:[%s803_s0] sm:$0xff]   ;;  %v685_v5 = vld [vmem:[%s803_s0 + $0x8] sm:$0xff]   ;;  %v579_v6 = vld [vmem:[%s802_s2 + $0x10] sm:$0xff]  }
   0x3   :  { %501 = vmatpush3.bf16.msra.mxu0 %v574_v1  ;;  %554 = vmatpush3.bf16.msra.mxu1 %v574_v1  ;;  %v580_v7 = vld [vmem:[%s802_s2 + $0x18] sm:$0xff]   ;;  %v450_v8 = vld [vmem:[%s804_s3] ss:$0 sm:$0xff]  ;;  %v582_v37 = vld [vmem:[%s805_s4 + $0x8] sm:$0xff]  }
   0x4   :  { %502 = vmatprep.subr.bf16.mxu0 %v612_v0  ;;  %553 = vmatprep.subr.bf16.mxu1 %v612_v0  ;;  %v581_v36 = vld [vmem:[%s805_s4] sm:$0xff]   ;;  %v583_v38 = vld [vmem:[%s805_s4 + $0x10] sm:$0xff]   ;;  %v584_v39 = vld [vmem:[%s805_s4 + $0x18] sm:$0xff]  }
   0x5   :  { %v463_v40 = vld [vmem:[%s804_s3 + $0x1] ss:$0 sm:$0xff] }
   0x7   :  { %503 = vmatpush3.bf16.msra.mxu0 %v575_v2  ;;  %555 = vmatpush3.bf16.msra.mxu1 %v575_v2 }
   0x8   :  { %516 = vmatprep.subr.bf16.mxu1 %v612_v0  ;;  %532 = vmatprep.subr.bf16.mxu0 %v612_v0 }
   0xa   :  { %505 = vmatmul.mubr.msk.bf16.vlgmr.msra.gmra.mrb[0].mxu0 %vm66_vm1, %v665_v3  ;;  %513 = vmatmul.mubr.msk.bf16.vlgmr.msra.gmra.mrb[0].mxu1 %vm66_vm1, %v670_v4 }
   0xb   :  { %508 = vmatprep.mubr.msk.bf16.mxu0 %vm613_vm0, %v612_v0  ;;  %520 = vmatprep.mubr.msk.bf16.mxu1 %vm613_vm0, %v612_v0 }
   0xc   :  { %517 = vmatpush3.bf16.msra.mxu1 %v579_v6  ;;  %533 = vmatpush3.bf16.msra.mxu0 %v581_v36 }
   0xd   :  { %518 = vmatprep.subr.bf16.mxu1 %v612_v0  ;;  %534 = vmatprep.subr.bf16.mxu0 %v612_v0 }
  0x10   :  { %519 = vmatpush3.bf16.msra.mxu1 %v580_v7  ;;  %535 = vmatpush3.bf16.msra.mxu0 %v582_v37 }
  0x11   :  { %536 = vmatprep.subr.bf16.mxu0 %v612_v0 }
  0x12   :  { %509 = vmatmul.mubr.msk.bf16.gmra.mrb[4].mxu0 %vm66_vm1, %v685_v5 }
  0x13   :  { %540 = vmatprep.mubr.msk.bf16.mxu0 %vm613_vm0, %v612_v0 }
  0x14   :  { %537 = vmatpush3.bf16.msra.mxu0 %v583_v38 }
  0x15   :  { %538 = vmatprep.subr.bf16.mxu0 %v612_v0 }
  0x18   :  { %539 = vmatpush3.bf16.msra.mxu0 %v584_v39 }
  0xdd   :  { %v110_v9 = vpop.f32.mrb[0].mxu0  ;;  %v126_v10 = vpop.f32.mrb[0].mxu1 }
  0xde   :  { %v111_v11 = vadd.f32 %v450_v8, %v110_v9  ;;  %v506_v12 = vpop.f32.mrb[1].mxu0  ;;  %v127_v13 = vadd.f32 %v450_v8, %v126_v10  ;;  %v514_v14 = vpop.f32.mrb[1].mxu1  ;;  %v237_v9 = vunpack.c.h.bf16 %v665_v3 }
  0xdf   :  { %v113_v15 = vpop.f32.mrb[2].mxu0  ;;  %v129_v16 = vpop.f32.mrb[2].mxu1 }
  0xe0   :  { %v114_v17 = vadd.f32 %v450_v8, %v113_v15  ;;  %v507_v18 = vpop.f32.mrb[3].mxu0  ;;  %v137_v19 = vmax.f32 %v127_v13, 0.0  ;;  %v130_v20 = vadd.f32 %v450_v8, %v129_v16  ;;  %v515_v21 = vpop.f32.mrb[3].mxu1  ;;  %v133_v22 = vmax.f32 %v111_v11, 0.0 }
  0xe1   :  { %v238_v16 = vunpack.c.l.bf16 %v685_v5 }
  0xe2   :  { %v134_v23 = vmax.f32 %v114_v17, 0.0  ;;  %v138_v24 = vmax.f32 %v130_v20, 0.0  ;;  %v239_v17 = vunpack.c.h.bf16 %v685_v5 }
  0xe4   :  { %v139_v25 = vpack.c.bf16 %v134_v23, %v133_v22  ;;  %v141_v26 = vpack.c.bf16 %v138_v24, %v137_v19  ;;  %v240_v23 = vunpack.c.l.bf16 %v670_v4  ;;  %v241_v24 = vunpack.c.h.bf16 %v670_v4  ;;  %v381_v4 = vld [vmem:[%s807_s1] sm:$0xff] }
  0xe5   :  { %v118_v27 = vpop.f32.mrb[4].mxu0 }
  0xe6   :  { %v119_v28 = vadd.f32 %v450_v8, %v118_v27  ;;  %v510_v29 = vpop.f32.mrb[5].mxu0  ;;  %521 = vmatmul.mubr.msk.bf16.vlgmr.msra.gmra.mrb[4].mxu1 %vm66_vm1, %v139_v25 }
  0xe7   :  { %v121_v30 = vpop.f32.mrb[6].mxu0  ;;  %524 = vmatprep.mubr.msk.bf16.mxu1 %vm613_vm0, %v612_v0 }
  0xe8   :  { %v122_v31 = vadd.f32 %v450_v8, %v121_v30  ;;  %v511_v32 = vpop.f32.mrb[7].mxu0  ;;  %v135_v33 = vmax.f32 %v119_v28, 0.0  ;;  %v236_v8 = vunpack.c.l.bf16 %v665_v3  ;;  %v469_v30 = vld [vmem:[%s806_s5] ss:$0 sm:$0xff] }
  0xea   :  { %v136_v34 = vmax.f32 %v122_v31, 0.0 }
  0xec   :  { %v140_v35 = vpack.c.bf16 %v136_v34, %v135_v33  ;;  %v382_v34 = vld [vmem:[%s807_s1 + $0x8] sm:$0xff] }
  0xee   :  { %525 = vmatmul.mubr.msk.bf16.gmra.mrb[8].mxu1 %vm66_vm1, %v140_v35 }
  0xef   :  { %528 = vmatprep.mubr.msk.bf16.mxu1 %vm613_vm0, %v612_v0 }
  0xf6   :  { %529 = vmatmul.mubr.msk.bf16.gmra.mrb[12].mxu1 %vm66_vm1, %v141_v26 }
 0x1b9   :  { %v207_v41 = vpop.f32.mrb[4].mxu1 }
 0x1ba   :  { %v208_v42 = vadd.f32 %v463_v40, %v207_v41  ;;  %v522_v43 = vpop.f32.mrb[5].mxu1 }
 0x1bb   :  { %v210_v44 = vpop.f32.mrb[6].mxu1 }
 0x1bc   :  { %v211_v45 = vadd.f32 %v463_v40, %v210_v44  ;;  %v523_v46 = vpop.f32.mrb[7].mxu1  ;;  %v230_v47 = vmax.f32 %v208_v42, 0.0  ;;  %v383_v42 = vld [vmem:[%s807_s1 + $0x10] sm:$0xff] }
 0x1bd   :  { %v384_v46 = vld [vmem:[%s807_s1 + $0x18] sm:$0xff] }
 0x1be   :  { %v231_v48 = vmax.f32 %v211_v45, 0.0 }
 0x1c0   :  { %v559_v49 = vpack.i.bf16 %v231_v48, %v230_v47 }
 0x1c1   :  { %v215_v50 = vpop.f32.mrb[8].mxu1 }
 0x1c2   :  { %v216_v51 = vadd.f32 %v463_v40, %v215_v50  ;;  %560 = vrot.lane.b32.xlu0 %v559_v49, %s614_s21  ;;  %v526_v52 = vpop.f32.mrb[9].mxu1 }
 0x1c3   :  { %v218_v53 = vpop.f32.mrb[10].mxu1 }
 0x1c4   :  { %v219_v54 = vadd.f32 %v463_v40, %v218_v53  ;;  %v527_v55 = vpop.f32.mrb[11].mxu1  ;;  %v232_v56 = vmax.f32 %v216_v51, 0.0 }
 0x1c6   :  { %v233_v57 = vmax.f32 %v219_v54, 0.0  ;;  %v385_v54 = vld [vmem:[%s807_s1 + $0x20] sm:$0xff] }
 0x1c8   :  { %v564_v58 = vpack.i.bf16 %v233_v57, %v232_v56  ;;  %v393_v56 = vlaneseq }
 0x1c9   :  { %v223_v59 = vpop.f32.mrb[12].mxu1 }
 0x1ca   :  { %v224_v60 = vadd.f32 %v463_v40, %v223_v59  ;;  %565 = vrot.lane.b32.xlu0 %v564_v58, %s614_s21  ;;  %v530_v61 = vpop.f32.mrb[13].mxu1 }
 0x1cb   :  { %v226_v62 = vpop.f32.mrb[14].mxu1  ;;  %v386_v61 = vld [vmem:[%s807_s1 + $0x28] sm:$0xff] }
 0x1cc   :  { %v227_v63 = vadd.f32 %v463_v40, %v226_v62  ;;  %v531_v1 = vpop.f32.mrb[15].mxu1  ;;  %v234_v2 = vmax.f32 %v224_v60, 0.0 }
 0x1ce   :  { %v235_v6 = vmax.f32 %v227_v63, 0.0 }
 0x1d0   :  { %v569_v7 = vpack.i.bf16 %v235_v6, %v234_v2 }
 0x1d2   :  { %570 = vrot.lane.b32.xlu1 %v569_v7, %s614_s21  ;;  %v394_v7 = vand.u32 127, %v393_v56 }
 0x1d4   :  { %vm395_vm3 = vcmp.ge.s32.totalorder %v394_v7, 8  ;;  %vm396_vm4 = vcmp.lt.s32.totalorder %v394_v7, 12 }
 0x1d5   :  { %vm768_vm5 = vmand %vm395_vm3, %vm396_vm4 }
 0x234   :  { %v561_v10 = vpop.permute.xlu0 %560 }
 0x235   :  { %v563_v11 = vunpack.i.h.bf16 %v561_v10  ;;  %v562_v12 = vunpack.i.l.bf16 %v561_v10 }
 0x237   :  { %v267_v13 = vsel %vm66_vm1, %v237_v9, %v563_v11  ;;  %v266_v14 = vsel %vm66_vm1, %v236_v8, %v562_v12 }
 0x238   :  { %v272_v15 = vpack.c.bf16 %v267_v13, %v266_v14 }
 0x23a   :  { %541 = vmatmul.mubr.msk.bf16.vlgmr.msra.gmra.mrb[8].mxu0 %vm314_vm2, %v272_v15 }
 0x23b   :  { %544 = vmatprep.mubr.msk.bf16.mxu0 %vm613_vm0, %v612_v0 }
 0x23c   :  { %v566_v18 = vpop.permute.xlu0 %565 }
 0x23d   :  { %v568_v3 = vunpack.i.h.bf16 %v566_v18  ;;  %v567_v19 = vunpack.i.l.bf16 %v566_v18 }
 0x23f   :  { %v269_v20 = vsel %vm66_vm1, %v239_v17, %v568_v3  ;;  %v268_v21 = vsel %vm66_vm1, %v238_v16, %v567_v19 }
 0x240   :  { %v273_v22 = vpack.c.bf16 %v269_v20, %v268_v21 }
 0x242   :  { %545 = vmatmul.mubr.msk.bf16.gmra.mrb[12].mxu0 %vm314_vm2, %v273_v22 }
 0x243   :  { %548 = vmatprep.mubr.msk.bf16.mxu0 %vm613_vm0, %v612_v0 }
 0x244   :  { %v571_v5 = vpop.permute.xlu1 %570 }
 0x245   :  { %v573_v25 = vunpack.i.h.bf16 %v571_v5  ;;  %v572_v26 = vunpack.i.l.bf16 %v571_v5 }
 0x247   :  { %v271_v27 = vsel %vm66_vm1, %v241_v24, %v573_v25  ;;  %v270_v28 = vsel %vm66_vm1, %v240_v23, %v572_v26 }
 0x248   :  { %v274_v29 = vpack.c.bf16 %v271_v27, %v270_v28 }
 0x24a   :  { %549 = vmatmul.mubr.msk.bf16.gmra.mrb[16].mxu0 %vm314_vm2, %v274_v29 }
 0x30d   :  { %v358_v31 = vpop.f32.mrb[8].mxu0 }
 0x30e   :  { %v359_v0 = vadd.f32 %v469_v30, %v358_v31  ;;  %v542_v32 = vpop.f32.mrb[9].mxu0 }
 0x30f   :  { %v361_v33 = vpop.f32.mrb[10].mxu0 }
 0x310   :  { %v387_v35 = vadd.f32 %v381_v4, %v359_v0  ;;  %v362_v36 = vadd.f32 %v469_v30, %v361_v33  ;;  %v543_v37 = vpop.f32.mrb[11].mxu0 }
 0x312   :  { %v477_v38 = vmul.f32 -1.442695, %v387_v35  ;;  %v388_v39 = vadd.f32 %v382_v34, %v362_v36 }
 0x314   :  { %588 = vpow2.f32 %v477_v38  ;;  %v478_v40 = vmul.f32 -1.442695, %v388_v39 }
 0x315   :  { %v366_v41 = vpop.f32.mrb[12].mxu0 }
 0x316   :  { %590 = vpow2.f32 %v478_v40  ;;  %v367_v43 = vadd.f32 %v469_v30, %v366_v41  ;;  %v546_v44 = vpop.f32.mrb[13].mxu0 }
 0x317   :  { %v369_v45 = vpop.f32.mrb[14].mxu0 }
 0x318   :  { %v389_v47 = vadd.f32 %v383_v42, %v367_v43  ;;  %v370_v48 = vadd.f32 %v469_v30, %v369_v45  ;;  %v547_v49 = vpop.f32.mrb[15].mxu0 }
 0x31a   :  { %v479_v50 = vmul.f32 -1.442695, %v389_v47  ;;  %v390_v51 = vadd.f32 %v384_v46, %v370_v48 }
 0x31c   :  { %592 = vpow2.f32 %v479_v50  ;;  %v480_v52 = vmul.f32 -1.442695, %v390_v51 }
 0x31d   :  { %v374_v53 = vpop.f32.mrb[16].mxu0 }
 0x31e   :  { %v589_v55 = vpop.eup %588  ;;  %594 = vpow2.f32 %v480_v52  ;;  %v375_v57 = vadd.f32 %v469_v30, %v374_v53  ;;  %v550_v58 = vpop.f32.mrb[17].mxu0 }
 0x31f   :  { %v416_v59 = vadd.f32 1.0, %v589_v55  ;;  %v377_v60 = vpop.f32.mrb[18].mxu0 }
 0x320   :  { %v591_v62 = vpop.eup %590  ;;  %v391_v63 = vadd.f32 %v385_v54, %v375_v57  ;;  %v378_v1 = vadd.f32 %v469_v30, %v377_v60  ;;  %v551_v2 = vpop.f32.mrb[19].mxu0 }
 0x321   :  { %596 = vrcp.f32 %v416_v59  ;;  %v417_v6 = vadd.f32 1.0, %v591_v62 }
 0x322   :  { %v481_v8 = vmul.f32 -1.442695, %v391_v63  ;;  %v392_v9 = vadd.f32 %v386_v61, %v378_v1 }
 0x323   :  { %598 = vrcp.f32 %v417_v6 }
 0x324   :  { %600 = vpow2.f32 %v481_v8  ;;  %v482_v10 = vmul.f32 -1.442695, %v392_v9 }
 0x326   :  { %v593_v11 = vpop.eup %592  ;;  %602 = vpow2.f32 %v482_v10 }
 0x327   :  { %v418_v12 = vadd.f32 1.0, %v593_v11 }
 0x328   :  { %v595_v13 = vpop.eup %594 }
 0x329   :  { %604 = vrcp.f32 %v418_v12  ;;  %v419_v15 = vadd.f32 1.0, %v595_v13 }
 0x32b   :  { %v597_v16 = vpop.eup %596  ;;  %606 = vrcp.f32 %v419_v15 }
 0x32c   :  { %v434_v17 = vsel %vm768_vm5, %v597_v16, %v387_v35 }
 0x32d   :  { %v599_v18 = vpop.eup %598  ;;  %440 = vst [vmem:[%s808_s6] sm:$0xff] %v434_v17 }
 0x32e   :  { %v601_v3 = vpop.eup %600  ;;  %v435_v19 = vsel %vm768_vm5, %v599_v18, %v388_v39 }
 0x32f   :  { %441 = vst [vmem:[%s808_s6 + $0x8] sm:$0xff] %v435_v19  ;;  %v420_v20 = vadd.f32 1.0, %v601_v3 }
 0x330   :  { %v603_v21 = vpop.eup %602 }
 0x331   :  { %608 = vrcp.f32 %v420_v20  ;;  %v421_v22 = vadd.f32 1.0, %v603_v21 }
 0x333   :  { %v605_v23 = vpop.eup %604  ;;  %610 = vrcp.f32 %v421_v22 }
 0x334   :  { %v436_v24 = vsel %vm768_vm5, %v605_v23, %v389_v47 }
 0x335   :  { %v607_v5 = vpop.eup %606  ;;  %442 = vst [vmem:[%s808_s6 + $0x10] sm:$0xff] %v436_v24 }
 0x336   :  { %v437_v25 = vsel %vm768_vm5, %v607_v5, %v390_v51 }
 0x337   :  { %443 = vst [vmem:[%s808_s6 + $0x18] sm:$0xff] %v437_v25 }
 0x33b   :  { %v609_v26 = vpop.eup %608 }
 0x33c   :  { %v438_v27 = vsel %vm768_vm5, %v609_v26, %v391_v63 }
 0x33d   :  { %v611_v28 = vpop.eup %610  ;;  %444 = vst [vmem:[%s808_s6 + $0x20] sm:$0xff] %v438_v27 }
 0x33e   :  { %v439_v29 = vsel %vm768_vm5, %v611_v28, %v392_v9 }
 0x33f   :  { %445 = vst [vmem:[%s808_s6 + $0x28] sm:$0xff] %v439_v29 }

// kernel: forward.2
= control target key start
LH: loop header
LB: loop body
LE: loop exit
PB: predicated region body
PF: predicated region fallthrough
CT: control target
= control target key end

     0   :  { %s3110_s15 = smov 0   ;;  %s3905_s0 = inlined_call_operand.vmem [shape: bf16[6,128,512], index: 0, kind: input, shape index: {}]   ;;  %s3906_s1 = inlined_call_operand.vmem [shape: bf16[6,32,128], index: 1, kind: input, shape index: {}]   ;;  %s3907_s2 = inlined_call_operand.vmem [shape: f32[6,32,4], index: 2, kind: input, shape index: {}]   ;;  %s3908_s3 = inlined_call_operand.vmem [shape: f32[6,1,512], index: 3, kind: input, shape index: {}]   ;;  %s3909_s4 = inlined_call_operand.vmem [shape: bf16[6,32,512], index: 4, kind: output, shape index: {}]  }
   0x1 LB: > { %s2567_s16 = sadd.s32 4294967295, %s3078_s15   ;;  %p2571_p0 = scmp.ge.s32.totalorder %s3078_s15, 1  ;;  %s3078_s15 = sphi %s3110_s15, %s14_s15  }
   0x2   : > { %p199_p1 = scmp.lt.s32.totalorder %s3078_s15, 3 }
   0x4   : > { %p200_p2 = pnand %p2571_p0, %p199_p1 }
   0x6   : > { %203 = sbr.rel (%p200_p2) target bundleno = 814 (0x32e), region = 36 }
   0xd   : > { %s244_s17 = smul.u32 3, %s2567_s16  ;;  %v3080_v0 = vmov 0   ;;  %s3083_s8 = smov 126  }
   0xe   : > { %544 = vmatprep.mubr.bf16.mxu0 %v3080_v0  ;;  %597 = vmatprep.mubr.bf16.mxu1 %v3080_v0 }
   0xf   : > { %p245_p3 = scmp.lt.s32.totalorder %s244_s17, 5  ;;  %2848 = vset.pattern.permute.xlu0 %v3080_v0  ;;  %2849 = vset.pattern.permute.xlu1 %v3080_v0 }
  0x11   : > { %s4006_s17 = smov (!%p245_p3, %s244_s17), 5 }
  0x12   : > { %s2807_s18 = sshll.u32 %s4006_s17, 8  ;;  %s2808_s22 = sshll.u32 %s4006_s17, 4 }
  0x13   : > { %s3128_s21 = scalar_lea.vmem %s3905_s0, %s2807_s18  ;;  %s3159_s25 = scalar_lea.vmem %s3906_s1, %s2808_s22 }
  0x14   : > { %v2862_v1 = vld [vmem:[%s3128_s21 + $0x4] ss:$16 sps:$4 sm:$0xff]   ;;  %v2864_v2 = vld [vmem:[%s3128_s21 + $0xc] ss:$16 sps:$4 sm:$0xff]   ;;  %v2866_v3 = vld [vmem:[%s3128_s21] ss:$16 sps:$4 sm:$0xff]  }
  0x15   : > { %512 = vmatprep.subr.bf16.mxu0 %v2862_v1  ;;  %v2867_v4 = vld [vmem:[%s3128_s21 + $0x8] ss:$16 sps:$4 sm:$0xff]   ;;  %565 = vmatprep.subr.bf16.mxu1 %v2864_v2  ;;  %v2868_v5 = vld [vmem:[%s3128_s21 + $0x24] ss:$16 sps:$4 sm:$0xff]   ;;  %v2870_v6 = vld [vmem:[%s3128_s21 + $0x2c] ss:$16 sps:$4 sm:$0xff]  }
  0x16   : > { %513 = vmatpush1.bf16.msra.mxu0 %v2866_v3  ;;  %566 = vmatpush1.bf16.msra.mxu1 %v2867_v4  ;;  %v2872_v7 = vld [vmem:[%s3128_s21 + $0x20] ss:$16 sps:$4 sm:$0xff]   ;;  %v2873_v8 = vld [vmem:[%s3128_s21 + $0x28] ss:$16 sps:$4 sm:$0xff]   ;;  %v2874_v9 = vld [vmem:[%s3128_s21 + $0x44] ss:$16 sps:$4 sm:$0xff]  }
  0x17   : > { %514 = vmatprep.subr.bf16.mxu0 %v2868_v5  ;;  %567 = vmatprep.subr.bf16.mxu1 %v2870_v6  ;;  %v2876_v10 = vld [vmem:[%s3128_s21 + $0x4c] ss:$16 sps:$4 sm:$0xff]   ;;  %v2878_v11 = vld [vmem:[%s3128_s21 + $0x40] ss:$16 sps:$4 sm:$0xff]   ;;  %v2879_v12 = vld [vmem:[%s3128_s21 + $0x48] ss:$16 sps:$4 sm:$0xff]  }
  0x18   : > { %v2880_v13 = vld [vmem:[%s3128_s21 + $0x64] ss:$16 sps:$4 sm:$0xff]   ;;  %v2882_v14 = vld [vmem:[%s3128_s21 + $0x6c] ss:$16 sps:$4 sm:$0xff]   ;;  %v2884_v15 = vld [vmem:[%s3128_s21 + $0x60] ss:$16 sps:$4 sm:$0xff]  }
  0x19   : > { %v2885_v16 = vld [vmem:[%s3128_s21 + $0x68] ss:$16 sps:$4 sm:$0xff]   ;;  %v2886_v17 = vld [vmem:[%s3128_s21 + $0x84] ss:$16 sps:$4 sm:$0xff]   ;;  %v2888_v18 = vld [vmem:[%s3128_s21 + $0x8c] ss:$16 sps:$4 sm:$0xff]  }
  0x1a   : > { %515 = vmatpush1.bf16.msra.mxu0 %v2872_v7  ;;  %568 = vmatpush1.bf16.msra.mxu1 %v2873_v8  ;;  %v2890_v19 = vld [vmem:[%s3128_s21 + $0x80] ss:$16 sps:$4 sm:$0xff]   ;;  %v2891_v20 = vld [vmem:[%s3128_s21 + $0x88] ss:$16 sps:$4 sm:$0xff]   ;;  %v2892_v21 = vld [vmem:[%s3128_s21 + $0xa4] ss:$16 sps:$4 sm:$0xff]  }
  0x1b   : > { %516 = vmatprep.subr.bf16.mxu0 %v2874_v9  ;;  %569 = vmatprep.subr.bf16.mxu1 %v2876_v10  ;;  %v2894_v22 = vld [vmem:[%s3128_s21 + $0xac] ss:$16 sps:$4 sm:$0xff]   ;;  %v2896_v23 = vld [vmem:[%s3128_s21 + $0xa0] ss:$16 sps:$4 sm:$0xff]   ;;  %v2897_v24 = vld [vmem:[%s3128_s21 + $0xa8] ss:$16 sps:$4 sm:$0xff]  }
  0x1c   : > { %v2898_v25 = vld [vmem:[%s3128_s21 + $0xc4] ss:$16 sps:$4 sm:$0xff]   ;;  %v2900_v26 = vld [vmem:[%s3128_s21 + $0xcc] ss:$16 sps:$4 sm:$0xff]   ;;  %v2902_v27 = vld [vmem:[%s3128_s21 + $0xc0] ss:$16 sps:$4 sm:$0xff]  }
  0x1d   : > { %v2903_v28 = vld [vmem:[%s3128_s21 + $0xc8] ss:$16 sps:$4 sm:$0xff]   ;;  %v2904_v29 = vld [vmem:[%s3128_s21 + $0xe4] ss:$16 sps:$4 sm:$0xff]   ;;  %v2906_v30 = vld [vmem:[%s3128_s21 + $0xec] ss:$16 sps:$4 sm:$0xff]  }
  0x1e   : > { %517 = vmatpush1.bf16.msra.mxu0 %v2878_v11  ;;  %570 = vmatpush1.bf16.msra.mxu1 %v2879_v12  ;;  %v2908_v31 = vld [vmem:[%s3128_s21 + $0xe0] ss:$16 sps:$4 sm:$0xff]   ;;  %v2909_v32 = vld [vmem:[%s3128_s21 + $0xe8] ss:$16 sps:$4 sm:$0xff]   ;;  %v2913_v33 = vld [vmem:[%s3128_s21 + $0x104] ss:$16 sps:$4 sm:$0xff]  }
  0x1f   : > { %518 = vmatprep.subr.bf16.mxu0 %v2880_v13  ;;  %571 = vmatprep.subr.bf16.mxu1 %v2882_v14  ;;  %v2916_v34 = vld [vmem:[%s3128_s21 + $0x10c] ss:$16 sps:$4 sm:$0xff]   ;;  %v2910_v35 = vld [vmem:[%s3159_s25] sm:$0xff]   ;;  %v2914_v37 = vld [vmem:[%s3128_s21 + $0x108] ss:$16 sps:$4 sm:$0xff]   ;;  %s2809_s26 = sshll.u32 %s4006_s17, 5 }
  0x20   : > { %v2911_v36 = vld [vmem:[%s3128_s21 + $0x100] ss:$16 sps:$4 sm:$0xff]   ;;  %v2919_v38 = vld [vmem:[%s3128_s21 + $0x124] ss:$16 sps:$4 sm:$0xff]   ;;  %v2922_v39 = vld [vmem:[%s3128_s21 + $0x12c] ss:$16 sps:$4 sm:$0xff]   ;;  %s3219_s29 = scalar_lea.vmem %s3907_s2, %s2809_s26 }
  0x21   : > { %v2917_v40 = vld [vmem:[%s3128_s21 + $0x120] ss:$16 sps:$4 sm:$0xff]   ;;  %v2920_v41 = vld [vmem:[%s3128_s21 + $0x128] ss:$16 sps:$4 sm:$0xff]   ;;  %v2925_v42 = vld [vmem:[%s3128_s21 + $0x144] ss:$16 sps:$4 sm:$0xff]  }
  0x22   : > { %519 = vmatpush1.bf16.msra.mxu0 %v2884_v15  ;;  %572 = vmatpush1.bf16.msra.mxu1 %v2885_v16  ;;  %v2928_v43 = vld [vmem:[%s3128_s21 + $0x14c] ss:$16 sps:$4 sm:$0xff]   ;;  %v2923_v45 = vld [vmem:[%s3128_s21 + $0x140] ss:$16 sps:$4 sm:$0xff]   ;;  %v2926_v46 = vld [vmem:[%s3128_s21 + $0x148] ss:$16 sps:$4 sm:$0xff]  }
  0x23   : > { %520 = vmatprep.subr.bf16.mxu0 %v2886_v17  ;;  %573 = vmatprep.subr.bf16.mxu1 %v2888_v18  ;;  %v2935_v44 = vld [vmem:[%s3159_s25 + $0x8] sm:$0xff]   ;;  %v2931_v47 = vld [vmem:[%s3128_s21 + $0x164] ss:$16 sps:$4 sm:$0xff]   ;;  %v2929_v49 = vld [vmem:[%s3128_s21 + $0x160] ss:$16 sps:$4 sm:$0xff]   ;;  %s2578_s30 = sshll.u32 %s4006_s17, 2 }
  0x24   : > { %v2934_v48 = vld [vmem:[%s3128_s21 + $0x16c] ss:$16 sps:$4 sm:$0xff]   ;;  %v2932_v50 = vld [vmem:[%s3128_s21 + $0x168] ss:$16 sps:$4 sm:$0xff]   ;;  %v2938_v51 = vld [vmem:[%s3128_s21 + $0x184] ss:$16 sps:$4 sm:$0xff]   ;;  %s3306_s7 = scalar_lea.vmem %s3908_s3, %s2578_s30 }
  0x25   : > { %v2941_v52 = vld [vmem:[%s3128_s21 + $0x18c] ss:$16 sps:$4 sm:$0xff]   ;;  %v2936_v53 = vld [vmem:[%s3128_s21 + $0x180] ss:$16 sps:$4 sm:$0xff]   ;;  %v2939_v54 = vld [vmem:[%s3128_s21 + $0x188] ss:$16 sps:$4 sm:$0xff]  }
  0x26   : > { %521 = vmatpush1.bf16.msra.mxu0 %v2890_v19  ;;  %574 = vmatpush1.bf16.msra.mxu1 %v2891_v20  ;;  %v2944_v55 = vld [vmem:[%s3128_s21 + $0x1a4] ss:$16 sps:$4 sm:$0xff]   ;;  %v2947_v56 = vld [vmem:[%s3128_s21 + $0x1ac] ss:$16 sps:$4 sm:$0xff]   ;;  %v2942_v57 = vld [vmem:[%s3128_s21 + $0x1a0] ss:$16 sps:$4 sm:$0xff]  }
  0x27   : > { %522 = vmatprep.subr.bf16.mxu0 %v2892_v21  ;;  %575 = vmatprep.subr.bf16.mxu1 %v2894_v22  ;;  %v2945_v58 = vld [vmem:[%s3128_s21 + $0x1a8] ss:$16 sps:$4 sm:$0xff]   ;;  %v2950_v59 = vld [vmem:[%s3128_s21 + $0x1c4] ss:$16 sps:$4 sm:$0xff]   ;;  %v2953_v60 = vld [vmem:[%s3128_s21 + $0x1cc] ss:$16 sps:$4 sm:$0xff]  }
  0x28   : > { %v2948_v61 = vld [vmem:[%s3128_s21 + $0x1c0] ss:$16 sps:$4 sm:$0xff]   ;;  %v2951_v62 = vld [vmem:[%s3128_s21 + $0x1c8] ss:$16 sps:$4 sm:$0xff]   ;;  %v2956_v63 = vld [vmem:[%s3128_s21 + $0x1e4] ss:$16 sps:$4 sm:$0xff]  }
  0x29   : > { %v2959_v1 = vld [vmem:[%s3128_s21 + $0x1ec] ss:$16 sps:$4 sm:$0xff]   ;;  %v2954_v2 = vld [vmem:[%s3128_s21 + $0x1e0] ss:$16 sps:$4 sm:$0xff]   ;;  %v2957_v3 = vld [vmem:[%s3128_s21 + $0x1e8] ss:$16 sps:$4 sm:$0xff]  }
  0x2a   : > { %523 = vmatpush1.bf16.msra.mxu0 %v2896_v23  ;;  %576 = vmatpush1.bf16.msra.mxu1 %v2897_v24  ;;  %v2963_v4 = vld [vmem:[%s3128_s21 + $0x204] ss:$16 sps:$4 sm:$0xff]   ;;  %v2966_v5 = vld [vmem:[%s3128_s21 + $0x20c] ss:$16 sps:$4 sm:$0xff]   ;;  %v2961_v7 = vld [vmem:[%s3128_s21 + $0x200] ss:$16 sps:$4 sm:$0xff]  }
  0x2b   : > { %524 = vmatprep.subr.bf16.mxu0 %v2898_v25  ;;  %577 = vmatprep.subr.bf16.mxu1 %v2900_v26  ;;  %v2960_v6 = vld [vmem:[%s3159_s25 + $0x10] sm:$0xff]   ;;  %v2964_v8 = vld [vmem:[%s3128_s21 + $0x208] ss:$16 sps:$4 sm:$0xff]   ;;  %v2972_v10 = vld [vmem:[%s3128_s21 + $0x22c] ss:$16 sps:$4 sm:$0xff]   ;;  %s2810_s9 = sshll.u32 %s4006_s17, 6 }
  0x2c   : > { %v2969_v9 = vld [vmem:[%s3128_s21 + $0x224] ss:$16 sps:$4 sm:$0xff]   ;;  %v2967_v11 = vld [vmem:[%s3128_s21 + $0x220] ss:$16 sps:$4 sm:$0xff]   ;;  %v2970_v12 = vld [vmem:[%s3128_s21 + $0x228] ss:$16 sps:$4 sm:$0xff]   ;;  %s3764_s12 = scalar_lea.vmem %s3909_s4, %s2810_s9 }
  0x2d   : > { %v2976_v13 = vld [vmem:[%s3128_s21 + $0x244] ss:$16 sps:$4 sm:$0xff]   ;;  %v2979_v14 = vld [vmem:[%s3128_s21 + $0x24c] ss:$16 sps:$4 sm:$0xff]   ;;  %v2974_v18 = vld [vmem:[%s3128_s21 + $0x240] ss:$16 sps:$4 sm:$0xff]  }
  0x2e   : > { %525 = vmatpush1.bf16.msra.mxu0 %v2902_v27  ;;  %578 = vmatpush1.bf16.msra.mxu1 %v2903_v28  ;;  %v3226_v15 = vld [vmem:[%s3219_s29] sm:$0xff]  ;;  %v2973_v16 = vld [vmem:[%s3159_s25 + $0x18] sm:$0xff]   ;;  %v3231_v17 = vld [vmem:[%s3219_s29 + $0x10] sm:$0xff] }
  0x2f   : > { %526 = vmatprep.subr.bf16.mxu0 %v2904_v29  ;;  %579 = vmatprep.subr.bf16.mxu1 %v2906_v30  ;;  %v2977_v19 = vld [vmem:[%s3128_s21 + $0x248] ss:$16 sps:$4 sm:$0xff]   ;;  %v2982_v20 = vld [vmem:[%s3128_s21 + $0x264] ss:$16 sps:$4 sm:$0xff]   ;;  %v2985_v21 = vld [vmem:[%s3128_s21 + $0x26c] ss:$16 sps:$4 sm:$0xff]  }
  0x30   : > { %322 = vperm.xlu0 %2848, %v3226_v15   ;;  %332 = vperm.xlu1 %2849, %v3231_v17   ;;  %v2980_v22 = vld [vmem:[%s3128_s21 + $0x260] ss:$16 sps:$4 sm:$0xff]   ;;  %v2983_v23 = vld [vmem:[%s3128_s21 + $0x268] ss:$16 sps:$4 sm:$0xff]   ;;  %v2988_v26 = vld [vmem:[%s3128_s21 + $0x284] ss:$16 sps:$4 sm:$0xff]  }
  0x31   : > { %v3241_v24 = vld [vmem:[%s3219_s29 + $0x8] sm:$0xff]  ;;  %v3244_v25 = vld [vmem:[%s3219_s29 + $0x18] sm:$0xff]  ;;  %v2986_v28 = vld [vmem:[%s3128_s21 + $0x280] ss:$16 sps:$4 sm:$0xff]  }
  0x32   : > { %527 = vmatpush1.bf16.msra.mxu0 %v2908_v31  ;;  %580 = vmatpush1.bf16.msra.mxu1 %v2909_v32  ;;  %v2991_v27 = vld [vmem:[%s3128_s21 + $0x28c] ss:$16 sps:$4 sm:$0xff]   ;;  %v2989_v29 = vld [vmem:[%s3128_s21 + $0x288] ss:$16 sps:$4 sm:$0xff]   ;;  %v2994_v31 = vld [vmem:[%s3128_s21 + $0x2a4] ss:$16 sps:$4 sm:$0xff]  }
  0x33   : > { %1244 = vmatprep.subr.bf16.mxu0 %v2913_v33  ;;  %1297 = vmatprep.subr.bf16.mxu1 %v2916_v34  ;;  %v3255_v30 = vld [vmem:[%s3219_s29 + $0x28] sm:$0xff]  ;;  %v3910_v33 = vmov 2   ;;  %v2992_v34 = vld [vmem:[%s3128_s21 + $0x2a0] ss:$16 sps:$4 sm:$0xff]  }
  0x34   : > { %327 = vperm.xlu0 %2848, %v3241_v24   ;;  %337 = vperm.xlu1 %2849, %v3244_v25   ;;  %v2997_v32 = vld [vmem:[%s3128_s21 + $0x2ac] ss:$16 sps:$4 sm:$0xff]  }
  0x35   : > { %545 = vmatmul.mubr.bf16.vlgmr.msra.gmra.mrb[0].mxu0 %v2910_v35  ;;  %598 = vmatmul.mubr.bf16.vlgmr.msra.gmra.mrb[0].mxu1 %v2910_v35  ;;  %v2995_v35 = vld [vmem:[%s3128_s21 + $0x2a8] ss:$16 sps:$4 sm:$0xff]  }
  0x36   : > { %1245 = vmatpush1.bf16.msra.mxu0 %v2911_v36  ;;  %1298 = vmatpush1.bf16.msra.mxu1 %v2914_v37  ;;  %v2753_v36 = vld [vmem:[%s3219_s29 + $0x50] sm:$0xff] }
  0x37   : > { %1246 = vmatprep.subr.bf16.mxu0 %v2919_v38  ;;  %1299 = vmatprep.subr.bf16.mxu1 %v2922_v39  ;;  %v3000_v37 = vld [vmem:[%s3128_s21 + $0x2c4] ss:$16 sps:$4 sm:$0xff]   ;;  %v3003_v38 = vld [vmem:[%s3128_s21 + $0x2cc] ss:$16 sps:$4 sm:$0xff]   ;;  %v2998_v39 = vld [vmem:[%s3128_s21 + $0x2c0] ss:$16 sps:$4 sm:$0xff]  }
  0x38   : > { %554 = vmatprep.mubr.bf16.mxu0 %v3080_v0  ;;  %607 = vmatprep.mubr.bf16.mxu1 %v3080_v0 }
  0x39   : > { %1059 = vperm.xlu0 %2848, %v3255_v30   ;;  %2850 = vset.pattern.permute.xlu1 %v3910_v33 }
  0x3a   : > { %1247 = vmatpush1.bf16.msra.mxu0 %v2917_v40  ;;  %1300 = vmatpush1.bf16.msra.mxu1 %v2920_v41  ;;  %v3001_v40 = vld [vmem:[%s3128_s21 + $0x2c8] ss:$16 sps:$4 sm:$0xff]   ;;  %v3006_v41 = vld [vmem:[%s3128_s21 + $0x2e4] ss:$16 sps:$4 sm:$0xff]  }
  0x3b   : > { %1248 = vmatprep.subr.bf16.mxu0 %v2925_v42  ;;  %1301 = vmatprep.subr.bf16.mxu1 %v2928_v43  ;;  %v3009_v42 = vld [vmem:[%s3128_s21 + $0x2ec] ss:$16 sps:$4 sm:$0xff]   ;;  %v3004_v43 = vld [vmem:[%s3128_s21 + $0x2e0] ss:$16 sps:$4 sm:$0xff]  }
  0x3c   : > { %792 = vperm.xlu1 %2850, %v3241_v24  }
  0x3d   : > { %555 = vmatmul.mubr.bf16.gmra.mrb[4].mxu0 %v2935_v44  ;;  %608 = vmatmul.mubr.bf16.gmra.mrb[4].mxu1 %v2935_v44  ;;  %v3007_v44 = vld [vmem:[%s3128_s21 + $0x2e8] ss:$16 sps:$4 sm:$0xff]  }
  0x3e   : > { %1249 = vmatpush1.bf16.msra.mxu0 %v2923_v45  ;;  %1302 = vmatpush1.bf16.msra.mxu1 %v2926_v46  ;;  %v3276_v45 = vld [vmem:[%s3219_s29 + $0x20] sm:$0xff] }
  0x3f   : > { %1250 = vmatprep.subr.bf16.mxu0 %v2931_v47  ;;  %1303 = vmatprep.subr.bf16.mxu1 %v2934_v48  ;;  %v3010_v46 = vld [vmem:[%s3159_s25 + $0x20] sm:$0xff]   ;;  %v3283_v47 = vld [vmem:[%s3219_s29 + $0x30] sm:$0xff]  ;;  %v3290_v48 = vld [vmem:[%s3219_s29 + $0x38] sm:$0xff] }
  0x40   : > { %1276 = vmatprep.mubr.bf16.mxu0 %v3080_v0  ;;  %1329 = vmatprep.mubr.bf16.mxu1 %v3080_v0 }
  0x41   : > { %1797 = vperm.xlu0 %2848, %v2753_v36   ;;  %796 = vperm.xlu1 %2850, %v3231_v17  }
  0x42   : > { %1251 = vmatpush1.bf16.msra.mxu0 %v2929_v49  ;;  %1304 = vmatpush1.bf16.msra.mxu1 %v2932_v50  ;;  %v3011_v49 = vld [vmem:[%s3159_s25 + $0x28] sm:$0xff]   ;;  %v2751_v50 = vld [vmem:[%s3219_s29 + $0x40] sm:$0xff] }
  0x43   : > { %1252 = vmatprep.subr.bf16.mxu0 %v2938_v51  ;;  %1305 = vmatprep.subr.bf16.mxu1 %v2941_v52  ;;  %v2752_v51 = vld [vmem:[%s3219_s29 + $0x48] sm:$0xff]  ;;  %v2754_v52 = vld [vmem:[%s3219_s29 + $0x58] sm:$0xff] }
  0x45   : > { %2852 = vset.pattern.permute.xlu0 %v3910_v33  ;;  %2851 = vset.pattern.permute.xlu1 %v3080_v0 }
  0x46   : > { %1253 = vmatpush1.bf16.msra.mxu0 %v2936_v53  ;;  %1306 = vmatpush1.bf16.msra.mxu1 %v2939_v54  ;;  %v3309_v54 = vld [vmem:[%s3306_s7 + $0x8] sm:$0xf] }
  0x47   : > { %1254 = vmatprep.subr.bf16.mxu0 %v2944_v55  ;;  %1307 = vmatprep.subr.bf16.mxu1 %v2947_v56 }
  0x48   : > { %788 = vperm.xlu0 %2852, %v3226_v15   ;;  %1054 = vperm.xlu1 %2851, %v3276_v45  }
  0x4a   : > { %1255 = vmatpush1.bf16.msra.mxu0 %v2942_v57  ;;  %1308 = vmatpush1.bf16.msra.mxu1 %v2945_v58 }
  0x4b   : > { %1256 = vmatprep.subr.bf16.mxu0 %v2950_v59  ;;  %1309 = vmatprep.subr.bf16.mxu1 %v2953_v60 }
  0x4c   : > { %800 = vperm.xlu0 %2852, %v3244_v25   ;;  %1064 = vperm.xlu1 %2851, %v3283_v47  }
  0x4e   : > { %1257 = vmatpush1.bf16.msra.mxu0 %v2948_v61  ;;  %1310 = vmatpush1.bf16.msra.mxu1 %v2951_v62  ;;  %v315_v61 = vld [vmem:[%s3306_s7] sm:$0xf] }
  0x4f   : > { %1258 = vmatprep.subr.bf16.mxu0 %v2956_v63  ;;  %1311 = vmatprep.subr.bf16.mxu1 %v2959_v1 }
  0x50   : > { %1528 = vperm.xlu0 %2852, %v3283_v47   ;;  %1069 = vperm.xlu1 %2851, %v3290_v48  }
  0x52   : > { %1259 = vmatpush1.bf16.msra.mxu0 %v2954_v2  ;;  %1312 = vmatpush1.bf16.msra.mxu1 %v2957_v3 }
  0x53   : > { %1977 = vmatprep.subr.bf16.mxu0 %v2963_v4  ;;  %2030 = vmatprep.subr.bf16.mxu1 %v2966_v5 }
  0x54   : > { %1787 = vperm.xlu1 %2851, %v2751_v50  }
  0x55   : > { %1277 = vmatmul.mubr.bf16.vlgmr.msra.gmra.mrb[8].mxu0 %v2960_v6  ;;  %1330 = vmatmul.mubr.bf16.vlgmr.msra.gmra.mrb[8].mxu1 %v2960_v6 }
  0x56   : > { %1978 = vmatpush1.bf16.msra.mxu0 %v2961_v7  ;;  %2031 = vmatpush1.bf16.msra.mxu1 %v2964_v8 }
  0x57   : > { %1979 = vmatprep.subr.bf16.mxu0 %v2969_v9  ;;  %2032 = vmatprep.subr.bf16.mxu1 %v2972_v10 }
  0x58   : > { %1286 = vmatprep.mubr.bf16.mxu0 %v3080_v0  ;;  %1339 = vmatprep.mubr.bf16.mxu1 %v3080_v0 }
  0x59   : > { %1792 = vperm.xlu1 %2851, %v2752_v51  }
  0x5a   : > { %1980 = vmatpush1.bf16.msra.mxu0 %v2967_v11  ;;  %2033 = vmatpush1.bf16.msra.mxu1 %v2970_v12 }
  0x5b   : > { %1981 = vmatprep.subr.bf16.mxu0 %v2976_v13  ;;  %2034 = vmatprep.subr.bf16.mxu1 %v2979_v14 }
  0x5d   : > { %1287 = vmatmul.mubr.bf16.gmra.mrb[12].mxu0 %v2973_v16  ;;  %1340 = vmatmul.mubr.bf16.gmra.mrb[12].mxu1 %v2973_v16 }
  0x5e   : > { %1982 = vmatpush1.bf16.msra.mxu0 %v2974_v18  ;;  %2035 = vmatpush1.bf16.msra.mxu1 %v2977_v19 }
  0x5f   : > { %1983 = vmatprep.subr.bf16.mxu0 %v2982_v20  ;;  %2036 = vmatprep.subr.bf16.mxu1 %v2985_v21 }
  0x60   : > { %2009 = vmatprep.mubr.bf16.mxu0 %v3080_v0  ;;  %2062 = vmatprep.mubr.bf16.mxu1 %v3080_v0 }
  0x61   : > { %1802 = vperm.xlu1 %2851, %v2754_v52  }
  0x62   : > { %1984 = vmatpush1.bf16.msra.mxu0 %v2980_v22  ;;  %2037 = vmatpush1.bf16.msra.mxu1 %v2983_v23 }
  0x63   : > { %1985 = vmatprep.subr.bf16.mxu0 %v2988_v26  ;;  %2038 = vmatprep.subr.bf16.mxu1 %v2991_v27 }
  0x65   : > { %2853 = vset.pattern.permute.xlu1 %v3910_v33 }
  0x66   : > { %1986 = vmatpush1.bf16.msra.mxu0 %v2986_v28  ;;  %2039 = vmatpush1.bf16.msra.mxu1 %v2989_v29 }
  0x67   : > { %1987 = vmatprep.subr.bf16.mxu0 %v2994_v31  ;;  %2040 = vmatprep.subr.bf16.mxu1 %v2997_v32 }
  0x68   : > { %1520 = vperm.xlu1 %2853, %v3276_v45  }
  0x6a   : > { %1988 = vmatpush1.bf16.msra.mxu0 %v2992_v34  ;;  %2041 = vmatpush1.bf16.msra.mxu1 %v2995_v35 }
  0x6b   : > { %1989 = vmatprep.subr.bf16.mxu0 %v3000_v37  ;;  %2042 = vmatprep.subr.bf16.mxu1 %v3003_v38 }
  0x6c   : > { %1524 = vperm.xlu1 %2853, %v3255_v30  }
  0x6e   : > { %1990 = vmatpush1.bf16.msra.mxu0 %v2998_v39  ;;  %2043 = vmatpush1.bf16.msra.mxu1 %v3001_v40 }
  0x6f   : > { %1991 = vmatprep.subr.bf16.mxu0 %v3006_v41  ;;  %2044 = vmatprep.subr.bf16.mxu1 %v3009_v42 }
  0x70   : > { %1532 = vperm.xlu1 %2853, %v3290_v48  }
  0x72   : > { %1992 = vmatpush1.bf16.msra.mxu0 %v3004_v43  ;;  %2045 = vmatpush1.bf16.msra.mxu1 %v3007_v44 }
  0x75   : > { %2010 = vmatmul.mubr.bf16.vlgmr.msra.gmra.mrb[16].mxu0 %v3010_v46  ;;  %2063 = vmatmul.mubr.bf16.vlgmr.msra.gmra.mrb[16].mxu1 %v3010_v46 }
  0x76   : > { %2019 = vmatprep.mubr.bf16.mxu0 %v3080_v0  ;;  %2072 = vmatprep.mubr.bf16.mxu1 %v3080_v0  ;;  %v619_v0 = vlaneseq }
  0x78   : > { %v620_v53 = vshrl.u32 %v619_v0, 7 }
  0x7a   : > { %v3311_v55 = vsub.s32 0, %v620_v53  ;;  %v3313_v56 = vsub.s32 1, %v620_v53  ;;  %v3323_v60 = vsub.s32 2, %v620_v53  ;;  %v3326_v62 = vsub.s32 3, %v620_v53 }
  0x7c   : > { %v3317_v57 = vrot.slane %v3309_v54, %v3311_v55  ;;  %v3321_v58 = vrot.slane %v3309_v54, %v3313_v56  ;;  %v3329_v1 = vrot.slane %v315_v61, %v3311_v55  ;;  %v3332_v2 = vrot.slane %v315_v61, %v3323_v60 }
  0x7d   : > { %2020 = vmatmul.mubr.bf16.gmra.mrb[20].mxu0 %v3011_v49  ;;  %2073 = vmatmul.mubr.bf16.gmra.mrb[20].mxu1 %v3011_v49  ;;  %v3335_v5 = vrot.slane %v315_v61, %v3313_v56  ;;  %v3338_v6 = vrot.slane %v315_v61, %v3326_v62 }
  0xaf   : > { %v323_v59 = vpop.permute.xlu0 %322  ;;  %v333_v37 = vpop.permute.xlu1 %332 }
  0xb3   : > { %v328_v63 = vpop.permute.xlu0 %327 }
 0x108   : > { %v546_v3 = vpop.f32.mrb[0].mxu0  ;;  %v599_v4 = vpop.f32.mrb[0].mxu1 }
 0x109   : > { %v3340_v7 = vadd.f32 %v546_v3, %v323_v59  ;;  %v3342_v8 = vadd.f32 %v599_v4, %v323_v59  ;;  %v548_v9 = vpop.f32.mrb[1].mxu0  ;;  %v601_v10 = vpop.f32.mrb[1].mxu1 }
 0x10a   : > { %v3344_v11 = vadd.f32 %v548_v9, %v323_v59  ;;  %v3346_v12 = vadd.f32 %v601_v10, %v323_v59  ;;  %v550_v13 = vpop.f32.mrb[2].mxu0  ;;  %v603_v14 = vpop.f32.mrb[2].mxu1 }
 0x10b   : > { %v639_v16 = vmul.f32 %v3329_v1, %v3340_v7  ;;  %v641_v18 = vmul.f32 %v3332_v2, %v3342_v8  ;;  %v3352_v19 = vadd.f32 %v550_v13, %v328_v63  ;;  %v3354_v20 = vadd.f32 %v603_v14, %v328_v63  ;;  %v552_v21 = vpop.f32.mrb[3].mxu0  ;;  %v605_v22 = vpop.f32.mrb[3].mxu1 }
 0x10c   : > { %v640_v23 = vmul.f32 %v3335_v5, %v3344_v11  ;;  %v642_v26 = vmul.f32 %v3338_v6, %v3346_v12  ;;  %v3360_v27 = vadd.f32 %v552_v21, %v328_v63  ;;  %v3362_v28 = vadd.f32 %v605_v22, %v328_v63  ;;  %v338_v4 = vpop.permute.xlu1 %337 }
 0x10d   : > { %v643_v29 = vmul.f32 %v3329_v1, %v3352_v19  ;;  %v645_v31 = vmul.f32 %v3332_v2, %v3354_v20  ;;  %v667_v43 = vmul.f32 %v639_v16, %v639_v16  ;;  %v851_v46 = vmul.f32 %v641_v18, %v641_v18 }
 0x10e   : > { %v644_v32 = vmul.f32 %v3335_v5, %v3360_v27  ;;  %v646_v34 = vmul.f32 %v3338_v6, %v3362_v28  ;;  %v839_v35 = vadd.f32 %v642_v26, %v641_v18  ;;  %v655_v36 = vadd.f32 %v640_v23, %v639_v16 }
 0x10f   : > { %v668_v44 = vmul.f32 %v640_v23, %v640_v23  ;;  %v852_v53 = vmul.f32 %v642_v26, %v642_v26  ;;  %v853_v9 = vmul.f32 %v645_v31, %v645_v31  ;;  %v669_v10 = vmul.f32 %v643_v29, %v643_v29 }
 0x110   : > { %840 = vadd.xlane.f32.xlu1 %v839_v35  ;;  %656 = vadd.xlane.f32.xlu0 %v655_v36  ;;  %v556_v38 = vpop.f32.mrb[4].mxu0  ;;  %v609_v39 = vpop.f32.mrb[4].mxu1  ;;  %v658_v49 = vadd.f32 %v644_v32, %v643_v29  ;;  %v842_v50 = vadd.f32 %v646_v34, %v645_v31  ;;  %v854_v16 = vmul.f32 %v646_v34, %v646_v34 }
 0x111   : > { %v3372_v40 = vadd.f32 %v556_v38, %v333_v37  ;;  %v558_v41 = vpop.f32.mrb[5].mxu0  ;;  %v611_v42 = vpop.f32.mrb[5].mxu1  ;;  %v675_v13 = vadd.f32 %v668_v44, %v667_v43  ;;  %v859_v14 = vadd.f32 %v852_v53, %v851_v46  ;;  %v670_v18 = vmul.f32 %v644_v32, %v644_v32 }
 0x112   : > { %v3374_v51 = vadd.f32 %v558_v41, %v333_v37  ;;  %v560_v52 = vpop.f32.mrb[6].mxu0  ;;  %v613_v0 = vpop.f32.mrb[6].mxu1  ;;  %v3380_v23 = vadd.f32 %v609_v39, %v333_v37  ;;  %v3382_v26 = vadd.f32 %v611_v42, %v333_v37  ;;  %v862_v38 = vadd.f32 %v854_v16, %v853_v9 }
 0x113   : > { %v562_v59 = vpop.f32.mrb[7].mxu0  ;;  %v615_v61 = vpop.f32.mrb[7].mxu1  ;;  %v647_v63 = vmul.f32 %v3329_v1, %v3372_v40  ;;  %v3384_v35 = vadd.f32 %v613_v0, %v338_v4  ;;  %v678_v41 = vadd.f32 %v670_v18, %v669_v10  ;;  %v3390_v34 = vadd.f32 %v560_v52, %v338_v4 }
 0x114   : > { %659 = vadd.xlane.f32.xlu1 %v658_v49  ;;  %843 = vadd.xlane.f32.xlu0 %v842_v50  ;;  %v648_v3 = vmul.f32 %v3335_v5, %v3374_v51  ;;  %3943 = vst [vmem:[#allocation2_spill] sm:$0xff] %v3382_v26  ;;  %v3386_v36 = vadd.f32 %v615_v61, %v338_v4  ;;  %v3388_v31 = vpop.permute.xlu1 %792  ;;  %v3082_v52 = vmov 3   ;;  %v1060_v9 = vpop.permute.xlu0 %1059 }
 0x115   : > { %v671_v21 = vmul.f32 %v647_v63, %v647_v63  ;;  %3944 = vst [vmem:[#allocation3_spill] sm:$0xff] %v3390_v34  ;;  %v3392_v43 = vadd.f32 %v562_v59, %v338_v4  ;;  %v649_v37 = vmul.f32 %v3332_v2, %v3380_v23  ;;  %v650_v39 = vmul.f32 %v3338_v6, %v3382_v26 }
 0x116   : > { %v672_v22 = vmul.f32 %v648_v3, %v648_v3  ;;  %v661_v32 = vadd.f32 %v648_v3, %v647_v63  ;;  %v653_v42 = vmul.f32 %v3332_v2, %v3384_v35  ;;  %v654_v44 = vmul.f32 %v3338_v6, %v3386_v36  ;;  %2855 = vset.pattern.permute.xlu1 %v3082_v52  ;;  %v2659_v6 = vld [vmem:[%s3306_s7 + $0x4] sm:$0xf] }
 0x117   : > { %3945 = vst [vmem:[#allocation4_spill] sm:$0xff] %v3392_v43  ;;  %v651_v49 = vmul.f32 %v3329_v1, %v3390_v34  ;;  %v652_v50 = vmul.f32 %v3335_v5, %v3392_v43  ;;  %2854 = vset.pattern.permute.xlu0 %v3082_v52  ;;  %v845_v53 = vadd.f32 %v650_v39, %v649_v37 }
 0x118   : > { %676 = vadd.xlane.f32.xlu1 %v675_v13  ;;  %860 = vadd.xlane.f32.xlu0 %v859_v14  ;;  %v681_v29 = vadd.f32 %v672_v22, %v671_v21  ;;  %v3402_v46 = vpop.permute.xlu1 %796  ;;  %v848_v0 = vadd.f32 %v654_v44, %v653_v42  ;;  %v857_v2 = vmul.f32 %v653_v42, %v653_v42 }
 0x119   : > { %3946 = vst [vmem:[#allocation5_spill] sm:$0xff] %v3402_v46  ;;  %v858_v59 = vmul.f32 %v654_v44, %v654_v44  ;;  %v664_v63 = vadd.f32 %v652_v50, %v651_v49  ;;  %v855_v3 = vmul.f32 %v649_v37, %v649_v37  ;;  %v856_v4 = vmul.f32 %v650_v39, %v650_v39 }
 0x11a   : > { %v3410_v1 = vrot.slane %v2659_v6, %v3323_v60  ;;  %v3413_v13 = vrot.slane %v2659_v6, %v3311_v55  ;;  %v3416_v16 = vrot.slane %v2659_v6, %v3326_v62  ;;  %v674_v44 = vmul.f32 %v652_v50, %v652_v50 }
 0x11b   : > { %v868_v61 = vadd.f32 %v858_v59, %v857_v2  ;;  %v865_v42 = vadd.f32 %v856_v4, %v855_v3 }
 0x11c   : > { %863 = vadd.xlane.f32.xlu1 %v862_v38  ;;  %679 = vadd.xlane.f32.xlu0 %v678_v41  ;;  %v1055_v10 = vpop.permute.xlu1 %1054  ;;  %v3423_v38 = vrot.slane %v2659_v6, %v3313_v56 }
 0x120   : > { %682 = vadd.xlane.f32.xlu1 %v681_v29  ;;  %662 = vadd.xlane.f32.xlu0 %v661_v32  ;;  %v673_v29 = vmul.f32 %v651_v49, %v651_v49 }
 0x124   : > { %849 = vadd.xlane.f32.xlu1 %v848_v0  ;;  %846 = vadd.xlane.f32.xlu0 %v845_v53 }
 0x128   : > { %v1278_v5 = vpop.f32.mrb[8].mxu0  ;;  %v1331_v14 = vpop.f32.mrb[8].mxu1  ;;  %869 = vadd.xlane.f32.xlu1 %v868_v61  ;;  %665 = vadd.xlane.f32.xlu0 %v664_v63 }
 0x129   : > { %v3418_v18 = vadd.f32 %v1278_v5, %v1055_v10  ;;  %v3420_v21 = vadd.f32 %v1331_v14, %v1055_v10  ;;  %v1280_v22 = vpop.f32.mrb[9].mxu0  ;;  %v1333_v41 = vpop.f32.mrb[9].mxu1 }
 0x12a   : > { %v3425_v32 = vadd.f32 %v1280_v22, %v1055_v10  ;;  %v3427_v55 = vadd.f32 %v1333_v41, %v1055_v10  ;;  %v1282_v37 = vpop.f32.mrb[10].mxu0  ;;  %v1335_v39 = vpop.f32.mrb[10].mxu1  ;;  %v684_v10 = vadd.f32 %v674_v44, %v673_v29 }
 0x12b   : > { %3947 = vst [vmem:[#allocation6_spill] sm:$0xff] %v3418_v18  ;;  %3948 = vst [vmem:[#allocation7_spill] sm:$0xff] %v3420_v21  ;;  %v1373_v52 = vmul.f32 %v3410_v1, %v3420_v21  ;;  %v3431_v0 = vadd.f32 %v1282_v37, %v1060_v9  ;;  %v1284_v53 = vpop.f32.mrb[11].mxu0  ;;  %v1337_v2 = vpop.f32.mrb[11].mxu1  ;;  %v1371_v49 = vmul.f32 %v3413_v13, %v3418_v18 }
 0x12c   : > { %3949 = vst [vmem:[#allocation8_spill] sm:$0xff] %v3425_v32  ;;  %3950 = vst [vmem:[#allocation9_spill] sm:$0xff] %v3427_v55  ;;  %v1374_v56 = vmul.f32 %v3416_v16, %v3427_v55  ;;  %v3435_v59 = vadd.f32 %v1284_v53, %v1060_v9  ;;  %866 = vadd.xlane.f32.xlu0 %v865_v42  ;;  %v1372_v6 = vmul.f32 %v3423_v38, %v3425_v32  ;;  %v1065_v5 = vpop.permute.xlu1 %1064 }
 0x12d   : > { %3951 = vst [vmem:[#allocation10_spill] sm:$0xff] %v3431_v0  ;;  %v3441_v50 = vadd.f32 %v1335_v39, %v1060_v9  ;;  %v3443_v61 = vadd.f32 %v1337_v2, %v1060_v9  ;;  %v1375_v63 = vmul.f32 %v3413_v13, %v3431_v0  ;;  %v1399_v53 = vmul.f32 %v1371_v49, %v1371_v49 }
 0x12e   : > { %3952 = vst [vmem:[#allocation11_spill] sm:$0xff] %v3435_v59  ;;  %v1376_v3 = vmul.f32 %v3423_v38, %v3435_v59  ;;  %v1572_v4 = vadd.f32 %v1374_v56, %v1373_v52  ;;  %v1387_v42 = vadd.f32 %v1372_v6, %v1371_v49  ;;  %v1400_v18 = vmul.f32 %v1372_v6, %v1372_v6 }
 0x12f   : > { %3953 = vst [vmem:[#allocation12_spill] sm:$0xff] %v3441_v50  ;;  %3954 = vst [vmem:[#allocation13_spill] sm:$0xff] %v3443_v61  ;;  %v1377_v41 = vmul.f32 %v3410_v1, %v3441_v50  ;;  %v1378_v9 = vmul.f32 %v3416_v16, %v3443_v61  ;;  %v1585_v55 = vmul.f32 %v1374_v56, %v1374_v56 }
 0x130   : > { %v1288_v14 = vpop.f32.mrb[12].mxu0  ;;  %v1341_v22 = vpop.f32.mrb[12].mxu1  ;;  %1573 = vadd.xlane.f32.xlu1 %v1572_v4  ;;  %685 = vadd.xlane.f32.xlu0 %v684_v10  ;;  %v1390_v32 = vadd.f32 %v1376_v3, %v1375_v63  ;;  %v1401_v26 = vmul.f32 %v1375_v63, %v1375_v63 }
 0x131   : > { %v1290_v37 = vpop.f32.mrb[13].mxu0  ;;  %v1343_v39 = vpop.f32.mrb[13].mxu1  ;;  %v3453_v2 = vadd.f32 %v1288_v14, %v1065_v5  ;;  %v1586_v50 = vmul.f32 %v1377_v41, %v1377_v41  ;;  %v1587_v59 = vmul.f32 %v1378_v9, %v1378_v9  ;;  %v1407_v14 = vadd.f32 %v1400_v18, %v1399_v53 }
 0x132   : > { %v3455_v33 = vadd.f32 %v1290_v37, %v1065_v5  ;;  %v1292_v29 = vpop.f32.mrb[14].mxu0  ;;  %v1345_v44 = vpop.f32.mrb[14].mxu1  ;;  %v1575_v0 = vadd.f32 %v1378_v9, %v1377_v41  ;;  %v1584_v37 = vmul.f32 %v1373_v52, %v1373_v52  ;;  %v3471_v56 = vadd.f32 %v1343_v39, %v1065_v5 }
 0x133   : > { %3955 = vst [vmem:[#allocation14_spill] sm:$0xff] %v3453_v2  ;;  %v1294_v4 = vpop.f32.mrb[15].mxu0  ;;  %v1347_v10 = vpop.f32.mrb[15].mxu1  ;;  %v1379_v61 = vmul.f32 %v3413_v13, %v3453_v2  ;;  %v1595_v6 = vadd.f32 %v1587_v59, %v1586_v50  ;;  %v1402_v2 = vmul.f32 %v1376_v3, %v1376_v3 }
 0x134   : > { %3956 = vst [vmem:[#allocation15_spill] sm:$0xff] %v3455_v33  ;;  %1391 = vadd.xlane.f32.xlu1 %v1390_v32  ;;  %1388 = vadd.xlane.f32.xlu0 %v1387_v42  ;;  %v1380_v49 = vmul.f32 %v3423_v38, %v3455_v33  ;;  %v1070_v21 = vpop.permute.xlu1 %1069  ;;  %v1592_v46 = vadd.f32 %v1585_v55, %v1584_v37 }
 0x135   : > { %v3461_v43 = vadd.f32 %v1345_v44, %v1070_v21  ;;  %v3463_v32 = vadd.f32 %v1347_v10, %v1070_v21  ;;  %v1403_v42 = vmul.f32 %v1379_v61, %v1379_v61  ;;  %v3465_v33 = vadd.f32 %v1341_v22, %v1065_v5 }
 0x136   : > { %v1404_v34 = vmul.f32 %v1380_v49, %v1380_v49  ;;  %v1410_v59 = vadd.f32 %v1402_v2, %v1401_v26  ;;  %v1382_v22 = vmul.f32 %v3416_v16, %v3471_v56  ;;  %v3477_v41 = vadd.f32 %v1292_v29, %v1070_v21 }
 0x137   : > { %v1385_v18 = vmul.f32 %v3410_v1, %v3461_v43  ;;  %v1386_v52 = vmul.f32 %v3416_v16, %v3463_v32  ;;  %v1381_v55 = vmul.f32 %v3410_v1, %v3465_v33  ;;  %v3479_v9 = vadd.f32 %v1294_v4, %v1070_v21 }
 0x138   : > { %1408 = vadd.xlane.f32.xlu1 %v1407_v14  ;;  %1576 = vadd.xlane.f32.xlu0 %v1575_v0  ;;  %v1413_v0 = vadd.f32 %v1404_v34, %v1403_v42  ;;  %v1788_v50 = vpop.permute.xlu1 %1787  ;;  %v1393_v34 = vadd.f32 %v1380_v49, %v1379_v61  ;;  %v1383_v39 = vmul.f32 %v3413_v13, %v3477_v41 }
 0x139   : > { %v1581_v63 = vadd.f32 %v1386_v52, %v1385_v18  ;;  %v1591_v3 = vmul.f32 %v1386_v52, %v1386_v52  ;;  %v1384_v1 = vmul.f32 %v3423_v38, %v3479_v9  ;;  %v1578_v53 = vadd.f32 %v1382_v22, %v1381_v55 }
 0x13a   : > { %v3489_v21 = vrot.slane %v3309_v54, %v3323_v60  ;;  %v1588_v4 = vmul.f32 %v1381_v55, %v1381_v55  ;;  %v1589_v10 = vmul.f32 %v1382_v22, %v1382_v22  ;;  %v3499_v14 = vrot.slane %v3309_v54, %v3326_v62 }
 0x13c   : > { %1596 = vadd.xlane.f32.xlu1 %v1595_v6  ;;  %1593 = vadd.xlane.f32.xlu0 %v1592_v46  ;;  %v1590_v46 = vmul.f32 %v1385_v18, %v1385_v18  ;;  %v1793_v5 = vpop.permute.xlu1 %1792  ;;  %v1598_v54 = vadd.f32 %v1589_v10, %v1588_v4 }
 0x13e   : > { %v1601_v26 = vadd.f32 %v1591_v3, %v1590_v46 }
 0x140   : > { %1414 = vadd.xlane.f32.xlu1 %v1413_v0  ;;  %1411 = vadd.xlane.f32.xlu0 %v1410_v59  ;;  %v1396_v0 = vadd.f32 %v1384_v1, %v1383_v39 }
 0x144   : > { %1582 = vadd.xlane.f32.xlu1 %v1581_v63  ;;  %1394 = vadd.xlane.f32.xlu0 %v1393_v34  ;;  %v1798_v34 = vpop.permute.xlu0 %1797 }
 0x148   : > { %v2011_v2 = vpop.f32.mrb[16].mxu0  ;;  %v2064_v44 = vpop.f32.mrb[16].mxu1  ;;  %1602 = vadd.xlane.f32.xlu1 %v1601_v26  ;;  %1579 = vadd.xlane.f32.xlu0 %v1578_v53  ;;  %v1405_v53 = vmul.f32 %v1383_v39, %v1383_v39 }
 0x149   : > { %v3485_v16 = vadd.f32 %v2011_v2, %v1788_v50  ;;  %v2013_v61 = vpop.f32.mrb[17].mxu0  ;;  %v2066_v29 = vpop.f32.mrb[17].mxu1  ;;  %v3491_v49 = vadd.f32 %v2064_v44, %v1788_v50  ;;  %v1406_v2 = vmul.f32 %v1384_v1, %v1384_v1 }
 0x14a   : > { %v3493_v13 = vadd.f32 %v2013_v61, %v1788_v50  ;;  %v3495_v38 = vadd.f32 %v2066_v29, %v1788_v50  ;;  %v2015_v37 = vpop.f32.mrb[18].mxu0  ;;  %v2068_v6 = vpop.f32.mrb[18].mxu1 }
 0x14b   : > { %3957 = vst [vmem:[#allocation16_spill] sm:$0xff] %v3485_v16  ;;  %3958 = vst [vmem:[#allocation17_spill] sm:$0xff] %v3491_v49  ;;  %v2104_v60 = vmul.f32 %v3317_v57, %v3485_v16  ;;  %v3503_v42 = vadd.f32 %v2015_v37, %v1793_v5  ;;  %v2017_v18 = vpop.f32.mrb[19].mxu0  ;;  %v2070_v52 = vpop.f32.mrb[19].mxu1  ;;  %v2106_v63 = vmul.f32 %v3489_v21, %v3491_v49 }
 0x14c   : > { %3959 = vst [vmem:[#allocation18_spill] sm:$0xff] %v3493_v13  ;;  %3960 = vst [vmem:[#allocation19_spill] sm:$0xff] %v3495_v38  ;;  %v2105_v59 = vmul.f32 %v3321_v58, %v3493_v13  ;;  %v3507_v55 = vadd.f32 %v2017_v18, %v1793_v5  ;;  %1397 = vadd.xlane.f32.xlu0 %v1396_v0  ;;  %v2107_v46 = vmul.f32 %v3499_v14, %v3495_v38  ;;  %v3517_v26 = vpop.permute.xlu1 %1802 }
 0x14d   : > { %3961 = vst [vmem:[#allocation20_spill] sm:$0xff] %v3503_v42  ;;  %v2108_v50 = vmul.f32 %v3317_v57, %v3503_v42  ;;  %v2132_v62 = vmul.f32 %v2104_v60, %v2104_v60  ;;  %v3519_v29 = vadd.f32 %v2068_v6, %v1793_v5  ;;  %v3521_v0 = vadd.f32 %v2070_v52, %v1793_v5 }
 0x14e   : > { %3962 = vst [vmem:[#allocation21_spill] sm:$0xff] %v3507_v55  ;;  %v2109_v3 = vmul.f32 %v3321_v58, %v3507_v55  ;;  %v2120_v22 = vadd.f32 %v2105_v59, %v2104_v60  ;;  %v2133_v44 = vmul.f32 %v2105_v59, %v2105_v59  ;;  %v2305_v13 = vadd.f32 %v2107_v46, %v2106_v63 }
 0x14f   : > { %v2134_v61 = vmul.f32 %v2108_v50, %v2108_v50  ;;  %3963 = vst [vmem:[#allocation22_spill] sm:$0xff] %v3519_v29  ;;  %3964 = vst [vmem:[#allocation23_spill] sm:$0xff] %v3521_v0 }
 0x150   : > { %v2021_v4 = vpop.f32.mrb[20].mxu0  ;;  %v2074_v10 = vpop.f32.mrb[20].mxu1  ;;  %2121 = vadd.xlane.f32.xlu1 %v2120_v22  ;;  %v2123_v37 = vadd.f32 %v2109_v3, %v2108_v50  ;;  %v2135_v18 = vmul.f32 %v2109_v3, %v2109_v3  ;;  %1599 = vadd.xlane.f32.xlu0 %v1598_v54  ;;  %v2140_v39 = vadd.f32 %v2133_v44, %v2132_v62 }
 0x151   : > { %v3523_v42 = vadd.f32 %v2021_v4, %v1798_v34  ;;  %v3525_v55 = vadd.f32 %v2074_v10, %v1798_v34  ;;  %v2023_v60 = vpop.f32.mrb[21].mxu0  ;;  %v2076_v38 = vpop.f32.mrb[21].mxu1  ;;  %v1416_v62 = vadd.f32 %v1406_v2, %v1405_v53  ;;  %v2111_v53 = vmul.f32 %v3499_v14, %v3521_v0 }
 0x152   : > { %v3527_v1 = vadd.f32 %v2023_v60, %v1798_v34  ;;  %v3529_v59 = vadd.f32 %v2076_v38, %v1798_v34  ;;  %v2025_v6 = vpop.f32.mrb[22].mxu0  ;;  %v2078_v49 = vpop.f32.mrb[22].mxu1  ;;  %v2143_v22 = vadd.f32 %v2135_v18, %v2134_v61  ;;  %v2110_v61 = vmul.f32 %v3489_v21, %v3519_v29 }
 0x153   : > { %3965 = vst [vmem:[#allocation24_spill] sm:$0xff] %v3523_v42  ;;  %3966 = vst [vmem:[#allocation25_spill] sm:$0xff] %v3525_v55  ;;  %v2112_v5 = vmul.f32 %v3317_v57, %v3523_v42  ;;  %v2114_v52 = vmul.f32 %v3489_v21, %v3525_v55  ;;  %v3536_v50 = vadd.f32 %v2025_v6, %v3517_v26  ;;  %v2027_v54 = vpop.f32.mrb[23].mxu0  ;;  %v2080_v3 = vpop.f32.mrb[23].mxu1 }
 0x154   : > { %3967 = vst [vmem:[#allocation26_spill] sm:$0xff] %v3527_v1  ;;  %3968 = vst [vmem:[#allocation27_spill] sm:$0xff] %v3529_v59  ;;  %v2113_v38 = vmul.f32 %v3321_v58, %v3527_v1  ;;  %v2115_v34 = vmul.f32 %v3499_v14, %v3529_v59  ;;  %v3543_v44 = vadd.f32 %v2027_v54, %v3517_v26  ;;  %2306 = vadd.xlane.f32.xlu1 %v2305_v13 }
 0x155   : > { %3969 = vst [vmem:[#allocation28_spill] sm:$0xff] %v3536_v50  ;;  %v2116_v4 = vmul.f32 %v3317_v57, %v3536_v50  ;;  %1417 = vadd.xlane.f32.xlu0 %v1416_v62  ;;  %v2136_v10 = vmul.f32 %v2112_v5, %v2112_v5  ;;  %v2321_v60 = vmul.f32 %v2114_v52, %v2114_v52 }
 0x156   : > { %3970 = vst [vmem:[#allocation29_spill] sm:$0xff] %v3543_v44  ;;  %v2117_v2 = vmul.f32 %v3321_v58, %v3543_v44  ;;  %v2311_v18 = vadd.f32 %v2115_v34, %v2114_v52  ;;  %v2322_v6 = vmul.f32 %v2115_v34, %v2115_v34  ;;  %v2126_v54 = vadd.f32 %v2113_v38, %v2112_v5 }
 0x157   : > { %v2137_v59 = vmul.f32 %v2113_v38, %v2113_v38  ;;  %v2138_v13 = vmul.f32 %v2116_v4, %v2116_v4  ;;  %v2308_v57 = vadd.f32 %v2111_v53, %v2110_v61  ;;  %v2317_v0 = vmul.f32 %v2106_v63, %v2106_v63 }
 0x158   : > { %2124 = vadd.xlane.f32.xlu1 %v2123_v37  ;;  %v2129_v55 = vadd.f32 %v2117_v2, %v2116_v4  ;;  %v2139_v29 = vmul.f32 %v2117_v2, %v2117_v2  ;;  %v2331_v50 = vadd.f32 %v2322_v6, %v2321_v60  ;;  %v2318_v42 = vmul.f32 %v2107_v46, %v2107_v46 }
 0x159   : > { %2312 = vadd.xlane.f32.xlu0 %v2311_v18  ;;  %v2146_v1 = vadd.f32 %v2137_v59, %v2136_v10  ;;  %v2319_v52 = vmul.f32 %v2110_v61, %v2110_v61  ;;  %v2320_v34 = vmul.f32 %v2111_v53, %v2111_v53  ;;  %v3554_v37 = vadd.f32 %v2078_v49, %v3517_v26  ;;  %v3563_v49 = vpop.permute.xlu0 %788 }
 0x15a   : > { %v2149_v62 = vadd.f32 %v2139_v29, %v2138_v13  ;;  %v2325_v58 = vadd.f32 %v2318_v42, %v2317_v0  ;;  %v3557_v59 = vadd.f32 %v2080_v3, %v3517_v26  ;;  %v3565_v26 = vpop.permute.xlu1 %1520 }
 0x15b   : > { %v2328_v5 = vadd.f32 %v2320_v34, %v2319_v52  ;;  %3971 = vst [vmem:[#allocation30_spill] sm:$0xff] %v3554_v37  ;;  %v2118_v29 = vmul.f32 %v3489_v21, %v3554_v37 }
 0x15c   : > { %2309 = vadd.xlane.f32.xlu1 %v2308_v57  ;;  %3972 = vst [vmem:[#allocation31_spill] sm:$0xff] %v3557_v59  ;;  %v2119_v63 = vmul.f32 %v3499_v14, %v3557_v59 }
 0x15d   : > { %2332 = vadd.xlane.f32.xlu0 %v2331_v50  ;;  %v2323_v46 = vmul.f32 %v2118_v29, %v2118_v29 }
 0x15e   : > { %v2314_v42 = vadd.f32 %v2119_v63, %v2118_v29  ;;  %v2324_v0 = vmul.f32 %v2119_v63, %v2119_v63  ;;  %v3569_v50 = vpop.permute.xlu1 %1524 }
 0x160   : > { %2141 = vadd.xlane.f32.xlu1 %v2140_v39  ;;  %v2334_v39 = vadd.f32 %v2324_v0, %v2323_v46 }
 0x162   : > { %v3573_v14 = vpop.permute.xlu1 %1532 }
 0x164   : > { %2326 = vadd.xlane.f32.xlu1 %v2325_v58 }
 0x168   : > { %2144 = vadd.xlane.f32.xlu1 %v2143_v22  ;;  %v3567_v22 = vpop.permute.xlu0 %800 }
 0x16c   : > { %2329 = vadd.xlane.f32.xlu1 %v2328_v5  ;;  %v3571_v21 = vpop.permute.xlu0 %1528 }
 0x170   : > { %2127 = vadd.xlane.f32.xlu1 %v2126_v54 }
 0x174   : > { %2130 = vadd.xlane.f32.xlu1 %v2129_v55 }
 0x178   : > { %2315 = vadd.xlane.f32.xlu1 %v2314_v42 }
 0x17c   : > { %2147 = vadd.xlane.f32.xlu1 %v2146_v1 }
 0x180   : > { %2150 = vadd.xlane.f32.xlu1 %v2149_v62 }
 0x184   : > { %2335 = vadd.xlane.f32.xlu1 %v2334_v39 }
 0x19d   : > { %v841_v55 = vpop.xlane.xlu1 %840  ;;  %v657_v3 = vpop.xlane.xlu0 %656 }
 0x19e   : > { %v871_v1 = vmul.f32 %v841_v55, %v3226_v15  ;;  %v687_v38 = vmul.f32 %v657_v3, %v3226_v15 }
 0x1a0   : > { %917 = vperm.xlu1 %2855, %v871_v1   ;;  %733 = vperm.xlu0 %2854, %v687_v38   ;;  %v695_v60 = vmul.f32 %v687_v38, %v687_v38  ;;  %v879_v13 = vmul.f32 %v871_v1, %v871_v1 }
 0x1a1   : > { %v660_v61 = vpop.xlane.xlu1 %659  ;;  %v844_v4 = vpop.xlane.xlu0 %843 }
 0x1a2   : > { %v688_v10 = vmul.f32 %v660_v61, %v3241_v24  ;;  %v872_v53 = vmul.f32 %v844_v4, %v3241_v24 }
 0x1a4   : > { %738 = vperm.xlu1 %2855, %v688_v10   ;;  %922 = vperm.xlu0 %2854, %v872_v53   ;;  %v880_v34 = vmul.f32 %v872_v53, %v872_v53  ;;  %v696_v63 = vmul.f32 %v688_v10, %v688_v10 }
 0x1a5   : > { %v677_v2 = vpop.xlane.xlu1 %676  ;;  %v861_v18 = vpop.xlane.xlu0 %860 }
 0x1a6   : > { %v691_v6 = vmul.f32 %v677_v2, %v3226_v15  ;;  %v875_v54 = vmul.f32 %v861_v18, %v3226_v15 }
 0x1a8   : > { %v699_v57 = vsub.f32 %v691_v6, %v695_v60  ;;  %v883_v62 = vsub.f32 %v875_v54, %v879_v13 }
 0x1a9   : > { %v864_v58 = vpop.xlane.xlu1 %863  ;;  %v680_v52 = vpop.xlane.xlu0 %679 }
 0x1aa   : > { %v876_v5 = vmul.f32 %v864_v58, %v3241_v24  ;;  %v692_v29 = vmul.f32 %v680_v52, %v3241_v24  ;;  %v703_v42 = vadd.f32 1e-05, %v699_v57  ;;  %v887_v0 = vadd.f32 1e-05, %v883_v62 }
 0x1ac   : > { %v884_v46 = vsub.f32 %v876_v5, %v880_v34  ;;  %v700_v39 = vsub.f32 %v692_v29, %v696_v63  ;;  %3012 = vrsqrt.f32 %v703_v42 }
 0x1ad   : > { %v683_v55 = vpop.xlane.xlu1 %682  ;;  %v663_v3 = vpop.xlane.xlu0 %662  ;;  %3014 = vrsqrt.f32 %v887_v0 }
 0x1ae   : > { %v693_v38 = vmul.f32 %v683_v55, %v3231_v17  ;;  %v689_v15 = vmul.f32 %v663_v3, %v3231_v17  ;;  %v888_v1 = vadd.f32 1e-05, %v884_v46  ;;  %v704_v4 = vadd.f32 1e-05, %v700_v39 }
 0x1b0   : > { %v697_v61 = vmul.f32 %v689_v15, %v689_v15  ;;  %743 = vperm.xlu1 %2855, %v689_v15   ;;  %3016 = vrsqrt.f32 %v888_v1 }
 0x1b1   : > { %v850_v53 = vpop.xlane.xlu1 %849  ;;  %v847_v2 = vpop.xlane.xlu0 %846  ;;  %3018 = vrsqrt.f32 %v704_v4 }
 0x1b2   : > { %v701_v24 = vsub.f32 %v693_v38, %v697_v61  ;;  %v874_v10 = vmul.f32 %v850_v53, %v3244_v25  ;;  %v873_v18 = vmul.f32 %v847_v2, %v3231_v17 }
 0x1b4   : > { %927 = vperm.xlu1 %2855, %v873_v18   ;;  %v705_v60 = vadd.f32 1e-05, %v701_v24  ;;  %v882_v13 = vmul.f32 %v874_v10, %v874_v10  ;;  %v881_v5 = vmul.f32 %v873_v18, %v873_v18 }
 0x1b5   : > { %v870_v6 = vpop.xlane.xlu1 %869  ;;  %v666_v54 = vpop.xlane.xlu0 %665 }
 0x1b6   : > { %v878_v57 = vmul.f32 %v870_v6, %v3244_v25  ;;  %v690_v62 = vmul.f32 %v666_v54, %v3244_v25  ;;  %3020 = vrsqrt.f32 %v705_v60  ;;  %v3013_v34 = vpop.eup %3012 }
 0x1b7   : > { %v3015_v42 = vpop.eup %3014 }
 0x1b8   : > { %v886_v58 = vsub.f32 %v878_v57, %v882_v13  ;;  %932 = vperm.xlu1 %2855, %v874_v10   ;;  %748 = vperm.xlu0 %2854, %v690_v62   ;;  %v698_v3 = vmul.f32 %v690_v62, %v690_v62 }
 0x1b9   : > { %v867_v52 = vpop.xlane.xlu0 %866 }
 0x1ba   : > { %v890_v29 = vadd.f32 1e-05, %v886_v58  ;;  %v877_v63 = vmul.f32 %v867_v52, %v3231_v17  ;;  %v3017_v55 = vpop.eup %3016 }
 0x1bb   : > { %v3019_v1 = vpop.eup %3018 }
 0x1bc   : > { %3022 = vrsqrt.f32 %v890_v29  ;;  %v885_v46 = vsub.f32 %v877_v63, %v881_v5  ;;  %715 = vrot.lane.b32.xlu1 %v3013_v34, %s3083_s8  ;;  %899 = vrot.lane.b32.xlu0 %v3015_v42, %s3083_s8 }
 0x1bd   : > { %v1574_v0 = vpop.xlane.xlu1 %1573  ;;  %v686_v39 = vpop.xlane.xlu0 %685 }
 0x1be   : > { %v889_v38 = vadd.f32 1e-05, %v885_v46  ;;  %v694_v15 = vmul.f32 %v686_v39, %v3244_v25  ;;  %v1604_v25 = vmul.f32 %v3276_v45, %v1574_v0 }
 0x1c0   : > { %3024 = vrsqrt.f32 %v889_v38  ;;  %v702_v61 = vsub.f32 %v694_v15, %v698_v3  ;;  %901 = vrot.lane.b32.xlu1 %v3017_v55, %s3083_s8  ;;  %717 = vrot.lane.b32.xlu0 %v3019_v1, %s3083_s8  ;;  %v3021_v2 = vpop.eup %3020  ;;  %v1612_v62 = vmul.f32 %v1604_v25, %v1604_v25 }
 0x1c1   : > { %v1392_v17 = vpop.xlane.xlu1 %1391  ;;  %v1389_v53 = vpop.xlane.xlu0 %1388 }
 0x1c2   : > { %v706_v4 = vadd.f32 1e-05, %v702_v61  ;;  %v1419_v60 = vmul.f32 %v3276_v45, %v1389_v53  ;;  %v1420_v58 = vmul.f32 %v3255_v30, %v1392_v17 }
 0x1c4   : > { %3026 = vrsqrt.f32 %v706_v4  ;;  %719 = vrot.lane.b32.xlu1 %v3021_v2, %s3083_s8  ;;  %v1428_v46 = vmul.f32 %v1420_v58, %v1420_v58  ;;  %v1427_v39 = vmul.f32 %v1419_v60, %v1419_v60 }
 0x1c5   : > { %v1409_v24 = vpop.xlane.xlu1 %1408  ;;  %v1577_v18 = vpop.xlane.xlu0 %1576 }
 0x1c6   : > { %v3023_v10 = vpop.eup %3022  ;;  %v1605_v52 = vmul.f32 %v3255_v30, %v1577_v18  ;;  %v1423_v0 = vmul.f32 %v3276_v45, %v1409_v24 }
 0x1c7   : > { %905 = vrot.lane.b32.xlu0 %v3023_v10, %s3083_s8 }
 0x1c8   : > { %v1431_v17 = vsub.f32 %v1423_v0, %v1427_v39  ;;  %v1613_v4 = vmul.f32 %v1605_v52, %v1605_v52 }
 0x1c9   : > { %v1597_v6 = vpop.xlane.xlu1 %1596  ;;  %v1594_v13 = vpop.xlane.xlu0 %1593 }
 0x1ca   : > { %v3025_v54 = vpop.eup %3024  ;;  %v1608_v57 = vmul.f32 %v3276_v45, %v1594_v13  ;;  %v1609_v55 = vmul.f32 %v3255_v30, %v1597_v6  ;;  %v1435_v45 = vadd.f32 1e-05, %v1431_v17 }
 0x1cb   : > { %903 = vrot.lane.b32.xlu1 %v3025_v54, %s3083_s8  ;;  %1465 = vperm.xlu0 %2854, %v1419_v60  }
 0x1cc   : > { %v1616_v29 = vsub.f32 %v1608_v57, %v1612_v62  ;;  %v1617_v2 = vsub.f32 %v1609_v55, %v1613_v4 }
 0x1cd   : > { %v1415_v34 = vpop.xlane.xlu1 %1414  ;;  %v1412_v63 = vpop.xlane.xlu0 %1411 }
 0x1ce   : > { %v3027_v5 = vpop.eup %3026  ;;  %v1424_v42 = vmul.f32 %v3255_v30, %v1412_v63  ;;  %v1620_v3 = vadd.f32 1e-05, %v1616_v29  ;;  %v1425_v10 = vmul.f32 %v3283_v47, %v1415_v34  ;;  %v1621_v60 = vadd.f32 1e-05, %v1617_v2 }
 0x1cf   : > { %721 = vrot.lane.b32.xlu1 %v3027_v5, %s3083_s8  ;;  %1655 = vperm.xlu0 %2854, %v1605_v52  }
 0x1d0   : > { %v1432_v38 = vsub.f32 %v1424_v42, %v1428_v46  ;;  %3028 = vrsqrt.f32 %v1620_v3 }
 0x1d1   : > { %v1395_v15 = vpop.xlane.xlu0 %1394  ;;  %v1583_v1 = vpop.xlane.xlu1 %1582 }
 0x1d2   : > { %v1421_v61 = vmul.f32 %v3283_v47, %v1395_v15  ;;  %v1436_v18 = vadd.f32 1e-05, %v1432_v38  ;;  %v1607_v34 = vmul.f32 %v3290_v48, %v1583_v1 }
 0x1d3   : > { %1650 = vperm.xlu1 %2855, %v1604_v25  }
 0x1d4   : > { %v1429_v53 = vmul.f32 %v1421_v61, %v1421_v61  ;;  %3030 = vrsqrt.f32 %v1436_v18  ;;  %v1615_v39 = vmul.f32 %v1607_v34, %v1607_v34  ;;  %v3620_v18 = vld [vmem:[%s3219_s29 + $0x48] sm:$0xff] }
 0x1d5   : > { %v1580_v54 = vpop.xlane.xlu0 %1579  ;;  %v1603_v30 = vpop.xlane.xlu1 %1602  ;;  %3032 = vrsqrt.f32 %v1435_v45 }
 0x1d6   : > { %v1433_v24 = vsub.f32 %v1425_v10, %v1429_v53  ;;  %v1606_v13 = vmul.f32 %v3283_v47, %v1580_v54  ;;  %3034 = vrsqrt.f32 %v1621_v60  ;;  %v1611_v63 = vmul.f32 %v3290_v48, %v1603_v30 }
 0x1d7   : > { %1470 = vperm.xlu1 %2855, %v1420_v58  }
 0x1d8   : > { %v1437_v57 = vadd.f32 1e-05, %v1433_v24  ;;  %v1614_v58 = vmul.f32 %v1606_v13, %v1606_v13  ;;  %v1619_v1 = vsub.f32 %v1611_v63, %v1615_v39  ;;  %v3625_v24 = vld [vmem:[%s3219_s29 + $0x40] sm:$0xff] }
 0x1d9   : > { %v1398_v6 = vpop.xlane.xlu0 %1397 }
 0x1da   : > { %v1422_v25 = vmul.f32 %v3290_v48, %v1398_v6  ;;  %v3029_v29 = vpop.eup %3028  ;;  %3036 = vrsqrt.f32 %v1437_v57  ;;  %v1623_v2 = vadd.f32 1e-05, %v1619_v1 }
 0x1db   : > { %1475 = vperm.xlu1 %2855, %v1421_v61  }
 0x1dc   : > { %1480 = vperm.xlu0 %2854, %v1422_v25   ;;  %v1430_v55 = vmul.f32 %v1422_v25, %v1422_v25 }
 0x1dd   : > { %v2122_v62 = vpop.xlane.xlu1 %2121  ;;  %v1600_v52 = vpop.xlane.xlu0 %1599 }
 0x1de   : > { %v1610_v5 = vmul.f32 %v3283_v47, %v1600_v52  ;;  %v3031_v15 = vpop.eup %3030  ;;  %v2152_v52 = vmul.f32 %v3625_v24, %v2122_v62 }
 0x1df   : > { %1660 = vperm.xlu1 %2855, %v1606_v13   ;;  %v3033_v17 = vpop.eup %3032 }
 0x1e0   : > { %v1618_v42 = vsub.f32 %v1610_v5, %v1614_v58  ;;  %1632 = vrot.lane.b32.xlu0 %v3029_v29, %s3083_s8  ;;  %v3035_v53 = vpop.eup %3034 }
 0x1e1   : > { %v2307_v46 = vpop.xlane.xlu1 %2306 }
 0x1e2   : > { %v1418_v0 = vpop.xlane.xlu0 %1417  ;;  %v1622_v3 = vadd.f32 1e-05, %v1618_v42  ;;  %v2337_v30 = vmul.f32 %v3625_v24, %v2307_v46  ;;  %v2160_v42 = vmul.f32 %v2152_v52, %v2152_v52 }
 0x1e3   : > { %v1426_v38 = vmul.f32 %v3290_v48, %v1418_v0  ;;  %1665 = vperm.xlu1 %2855, %v1607_v34  }
 0x1e4   : > { %3038 = vrsqrt.f32 %v1622_v3  ;;  %1449 = vrot.lane.b32.xlu0 %v3031_v15, %s3083_s8  ;;  %v3037_v10 = vpop.eup %3036  ;;  %v2345_v13 = vmul.f32 %v2337_v30, %v2337_v30 }
 0x1e5   : > { %v1434_v47 = vsub.f32 %v1426_v38, %v1430_v55  ;;  %v2125_v61 = vpop.xlane.xlu1 %2124 }
 0x1e6   : > { %v2153_v54 = vmul.f32 %v3620_v18, %v2125_v61 }
 0x1e7   : > { %v1438_v4 = vadd.f32 1e-05, %v1434_v47  ;;  %1447 = vrot.lane.b32.xlu1 %v3033_v17, %s3083_s8  ;;  %v2313_v47 = vpop.xlane.xlu0 %2312 }
 0x1e8   : > { %1634 = vrot.lane.b32.xlu0 %v3035_v53, %s3083_s8  ;;  %v2161_v55 = vmul.f32 %v2153_v54, %v2153_v54 }
 0x1e9   : > { %3040 = vrsqrt.f32 %v1438_v4  ;;  %v2310_v48 = vpop.xlane.xlu1 %2309 }
 0x1ea   : > { %3042 = vrsqrt.f32 %v1623_v2  ;;  %v3636_v62 = vmul.f32 %v3620_v18, %v2310_v48 }
 0x1eb   : > { %1451 = vrot.lane.b32.xlu1 %v3037_v10, %s3083_s8  ;;  %v3642_v10 = vld [vmem:[%s3219_s29 + $0x50] sm:$0xff] }
 0x1ec   : > { %2203 = vperm.xlu0 %2854, %v2153_v54   ;;  %v2346_v61 = vmul.f32 %v3636_v62, %v3636_v62  ;;  %v2333_v54 = vpop.xlane.xlu0 %2332 }
 0x1ed   : > { %v2142_v45 = vpop.xlane.xlu1 %2141 }
 0x1ee   : > { %v3039_v60 = vpop.eup %3038  ;;  %v2156_v58 = vmul.f32 %v3625_v24, %v2142_v45  ;;  %v2339_v45 = vmul.f32 %v3642_v10, %v2313_v47 }
 0x1ef   : > { %1636 = vrot.lane.b32.xlu1 %v3039_v60, %s3083_s8 }
 0x1f0   : > { %v2164_v46 = vsub.f32 %v2156_v58, %v2160_v42 }
 0x1f1   : > { %v2327_v6 = vpop.xlane.xlu1 %2326 }
 0x1f2   : > { %v2341_v25 = vmul.f32 %v3625_v24, %v2327_v6  ;;  %v2168_v3 = vadd.f32 1e-05, %v2164_v46 }
 0x1f3   : > { %v3041_v57 = vpop.eup %3040 }
 0x1f4   : > { %v2349_v34 = vsub.f32 %v2341_v25, %v2345_v13  ;;  %1453 = vrot.lane.b32.xlu1 %v3041_v57, %s3083_s8  ;;  %v3043_v63 = vpop.eup %3042  ;;  %v3648_v13 = vld [vmem:[%s3219_s29 + $0x58] sm:$0xff]  ;;  %v2343_v25 = vmul.f32 %v3642_v10, %v2333_v54  ;;  %v2347_v57 = vmul.f32 %v2339_v45, %v2339_v45 }
 0x1f5   : > { %v2145_v5 = vpop.xlane.xlu1 %2144 }
 0x1f6   : > { %v2353_v29 = vadd.f32 1e-05, %v2349_v34  ;;  %v2157_v0 = vmul.f32 %v3620_v18, %v2145_v5 }
 0x1f8   : > { %3044 = vrsqrt.f32 %v2353_v29  ;;  %1638 = vrot.lane.b32.xlu1 %v3043_v63, %s3083_s8  ;;  %v2165_v38 = vsub.f32 %v2157_v0, %v2161_v55  ;;  %v2351_v29 = vsub.f32 %v2343_v25, %v2347_v57  ;;  %v3938_v25 = vmov 1  }
 0x1f9   : > { %v2330_v39 = vpop.xlane.xlu1 %2329  ;;  %3046 = vrsqrt.f32 %v2168_v3  ;;  %v3973_v57 = vmov 2  }
 0x1fa   : > { %v2342_v15 = vmul.f32 %v3620_v18, %v2330_v39  ;;  %v2169_v17 = vadd.f32 1e-05, %v2165_v38  ;;  %v2355_v38 = vadd.f32 1e-05, %v2351_v29 }
 0x1fc   : > { %2198 = vperm.xlu1 %2855, %v2152_v52   ;;  %v2350_v4 = vsub.f32 %v2342_v15, %v2346_v61  ;;  %3048 = vrsqrt.f32 %v2169_v17 }
 0x1fd   : > { %v2128_v1 = vpop.xlane.xlu1 %2127 }
 0x1fe   : > { %v2154_v48 = vmul.f32 %v3642_v10, %v2128_v1  ;;  %v2354_v60 = vadd.f32 1e-05, %v2350_v4 }
 0x200   : > { %2383 = vperm.xlu1 %2855, %v2337_v30   ;;  %3050 = vrsqrt.f32 %v2354_v60  ;;  %v2162_v34 = vmul.f32 %v2154_v48, %v2154_v48 }
 0x201   : > { %v2131_v53 = vpop.xlane.xlu1 %2130 }
 0x202   : > { %v3045_v2 = vpop.eup %3044  ;;  %v2155_v30 = vmul.f32 %v3648_v13, %v2131_v53 }
 0x203   : > { %2365 = vrot.lane.b32.xlu0 %v3045_v2, %s3083_s8  ;;  %v3047_v5 = vpop.eup %3046 }
 0x204   : > { %2208 = vperm.xlu1 %2855, %v2154_v48   ;;  %v2163_v46 = vmul.f32 %v2155_v30, %v2155_v30 }
 0x205   : > { %v2316_v6 = vpop.xlane.xlu1 %2315 }
 0x206   : > { %v2340_v0 = vmul.f32 %v3648_v13, %v2316_v6  ;;  %v3049_v3 = vpop.eup %3048 }
 0x208   : > { %2213 = vperm.xlu1 %2855, %v2155_v30   ;;  %v2348_v47 = vmul.f32 %v2340_v0, %v2340_v0 }
 0x209   : > { %v2148_v52 = vpop.xlane.xlu1 %2147 }
 0x20a   : > { %v2158_v58 = vmul.f32 %v3642_v10, %v2148_v52  ;;  %v3051_v4 = vpop.eup %3050 }
 0x20c   : > { %v2166_v63 = vsub.f32 %v2158_v58, %v2162_v34  ;;  %2180 = vrot.lane.b32.xlu1 %v3047_v5, %s3083_s8 }
 0x20d   : > { %v2151_v42 = vpop.xlane.xlu1 %2150 }
 0x20e   : > { %v2170_v39 = vadd.f32 1e-05, %v2166_v63  ;;  %v2159_v55 = vmul.f32 %v3648_v13, %v2151_v42 }
 0x210   : > { %3052 = vrsqrt.f32 %v2170_v39  ;;  %v2167_v15 = vsub.f32 %v2159_v55, %v2163_v46  ;;  %2182 = vrot.lane.b32.xlu1 %v3049_v3, %s3083_s8  ;;  %v3064_v46 = vld [vmem:[%s3219_s29] sm:$0xff] }
 0x211   : > { %v2336_v1 = vpop.xlane.xlu1 %2335  ;;  %3054 = vrsqrt.f32 %v2355_v38  ;;  %v3065_v38 = vld [vmem:[%s3219_s29 + $0x8] sm:$0xff] }
 0x212   : > { %v2171_v61 = vadd.f32 1e-05, %v2167_v15  ;;  %v2344_v17 = vmul.f32 %v3648_v13, %v2336_v1 }
 0x214   : > { %3056 = vrsqrt.f32 %v2171_v61  ;;  %v2352_v53 = vsub.f32 %v2344_v17, %v2348_v47  ;;  %2367 = vrot.lane.b32.xlu1 %v3051_v4, %s3083_s8  ;;  %v3066_v17 = vld [vmem:[%s3219_s29 + $0x10] sm:$0xff] }
 0x216   : > { %v2356_v2 = vadd.f32 1e-05, %v2352_v53  ;;  %v3067_v53 = vld [vmem:[%s3219_s29 + $0x18] sm:$0xff] }
 0x218   : > { %3058 = vrsqrt.f32 %v2356_v2  ;;  %2393 = vperm.xlu1 %2855, %v2339_v45  }
 0x21a   : > { %v3053_v48 = vpop.eup %3052 }
 0x21b   : > { %2184 = vrot.lane.b32.xlu0 %v3053_v48, %s3083_s8  ;;  %v3055_v54 = vpop.eup %3054 }
 0x21e   : > { %v3057_v60 = vpop.eup %3056 }
 0x21f   : > { %2186 = vrot.lane.b32.xlu1 %v3057_v60, %s3083_s8  ;;  %2369 = vrot.lane.b32.xlu0 %v3055_v54, %s3083_s8  ;;  %v3664_v30 = vpop.permute.xlu1 %917  ;;  %v3671_v52 = vpop.permute.xlu0 %733 }
 0x222   : > { %v3059_v6 = vpop.eup %3058 }
 0x223   : > { %2371 = vrot.lane.b32.xlu1 %v3059_v6, %s3083_s8  ;;  %2388 = vperm.xlu0 %2854, %v3636_v62   ;;  %v3667_v45 = vpop.permute.xlu1 %738  ;;  %v3676_v62 = vpop.permute.xlu0 %922 }
 0x227   : > { %2398 = vperm.xlu1 %2855, %v2340_v0   ;;  %2858 = vset.pattern.permute.xlu0 %v3938_v25 }
 0x22b   : > { %2856 = vset.pattern.permute.xlu1 %v3973_v57 }
 0x22c   : > { %2253 = vperm.xlu1 %2856, %v3625_v24  }
 0x22f   : > { %v3673_v34 = vpop.permute.xlu1 %743 }
 0x230   : > { %2857 = vset.pattern.permute.xlu1 %v3938_v25 }
 0x233   : > { %v3678_v58 = vpop.permute.xlu1 %927 }
 0x237   : > { %v3680_v5 = vpop.permute.xlu1 %932  ;;  %v3682_v29 = vpop.permute.xlu0 %748 }
 0x23b   : > { %v716_v63 = vpop.permute.xlu1 %715  ;;  %v900_v42 = vpop.permute.xlu0 %899 }
 0x23c   : > { %v727_v0 = vmul.f32 %v3064_v46, %v716_v63  ;;  %v911_v39 = vmul.f32 %v3064_v46, %v900_v42 }
 0x23e   : > { %761 = vperm.xlu1 %2857, %v727_v0   ;;  %945 = vperm.xlu0 %2858, %v911_v39  }
 0x23f   : > { %v902_v55 = vpop.permute.xlu1 %901  ;;  %v718_v3 = vpop.permute.xlu0 %717 }
 0x240   : > { %v912_v15 = vmul.f32 %v3065_v38, %v902_v55  ;;  %v728_v1 = vmul.f32 %v3065_v38, %v718_v3 }
 0x242   : > { %950 = vperm.xlu1 %2857, %v912_v15   ;;  %766 = vperm.xlu0 %2858, %v728_v1   ;;  %v3068_v15 = vld [vmem:[%s3219_s29 + $0x20] sm:$0xff] }
 0x243   : > { %v720_v47 = vpop.permute.xlu1 %719  ;;  %v906_v61 = vpop.permute.xlu0 %905 }
 0x244   : > { %v729_v4 = vmul.f32 %v3066_v17, %v720_v47  ;;  %v914_v2 = vmul.f32 %v3067_v53, %v906_v61 }
 0x246   : > { %771 = vperm.xlu1 %2857, %v729_v4   ;;  %960 = vperm.xlu0 %2858, %v914_v2  }
 0x247   : > { %v904_v48 = vpop.permute.xlu1 %903 }
 0x248   : > { %v913_v54 = vmul.f32 %v3066_v17, %v904_v48  ;;  %v3069_v17 = vld [vmem:[%s3219_s29 + $0x28] sm:$0xff] }
 0x24a   : > { %955 = vperm.xlu1 %2857, %v913_v54   ;;  %v3688_v63 = vpop.permute.xlu0 %1465 }
 0x24b   : > { %v722_v60 = vpop.permute.xlu1 %721 }
 0x24c   : > { %v730_v6 = vmul.f32 %v3067_v53, %v722_v60 }
 0x24e   : > { %776 = vperm.xlu1 %2857, %v730_v6   ;;  %v3694_v0 = vpop.permute.xlu0 %1655  ;;  %v3070_v6 = vld [vmem:[%s3219_s29 + $0x30] sm:$0xff] }
 0x252   : > { %v3690_v42 = vpop.permute.xlu1 %1650 }
 0x256   : > { %v3692_v46 = vpop.permute.xlu1 %1470 }
 0x25a   : > { %v3696_v39 = vpop.permute.xlu1 %1475 }
 0x25b   : > { %v3698_v55 = vpop.permute.xlu0 %1480 }
 0x25e   : > { %v3700_v3 = vpop.permute.xlu1 %1660 }
 0x25f   : > { %v1633_v38 = vpop.permute.xlu0 %1632 }
 0x260   : > { %v1644_v1 = vmul.f32 %v3068_v15, %v1633_v38 }
 0x262   : > { %v3703_v47 = vpop.permute.xlu1 %1665  ;;  %1678 = vperm.xlu0 %2858, %v1644_v1   ;;  %v3071_v1 = vld [vmem:[%s3219_s29 + $0x38] sm:$0xff] }
 0x263   : > { %v1450_v61 = vpop.permute.xlu0 %1449 }
 0x264   : > { %v1460_v4 = vmul.f32 %v3069_v17, %v1450_v61 }
 0x266   : > { %v1448_v53 = vpop.permute.xlu1 %1447  ;;  %1498 = vperm.xlu0 %2858, %v1460_v4  }
 0x267   : > { %v1459_v2 = vmul.f32 %v3068_v15, %v1448_v53  ;;  %v1635_v48 = vpop.permute.xlu0 %1634 }
 0x268   : > { %v1645_v54 = vmul.f32 %v3069_v17, %v1635_v48 }
 0x269   : > { %1493 = vperm.xlu1 %2857, %v1459_v2  }
 0x26a   : > { %v1452_v60 = vpop.permute.xlu1 %1451  ;;  %1683 = vperm.xlu0 %2858, %v1645_v54  }
 0x26b   : > { %v1461_v25 = vmul.f32 %v3070_v6, %v1452_v60  ;;  %v3716_v2 = vpop.permute.xlu0 %2203 }
 0x26d   : > { %1503 = vperm.xlu1 %2857, %v1461_v25  }
 0x26e   : > { %v1637_v59 = vpop.permute.xlu1 %1636 }
 0x26f   : > { %v1646_v38 = vmul.f32 %v3070_v6, %v1637_v59 }
 0x271   : > { %1688 = vperm.xlu1 %2857, %v1646_v38  }
 0x272   : > { %v1454_v37 = vpop.permute.xlu1 %1453 }
 0x273   : > { %v1462_v44 = vmul.f32 %v3071_v1, %v1454_v37 }
 0x275   : > { %1508 = vperm.xlu0 %2858, %v1462_v44   ;;  %v2366_v48 = vpop.permute.xlu0 %2365 }
 0x276   : > { %v1639_v61 = vpop.permute.xlu1 %1638  ;;  %v2377_v44 = vmul.f32 %v3625_v24, %v2366_v48 }
 0x277   : > { %v1647_v16 = vmul.f32 %v3071_v1, %v1639_v61 }
 0x279   : > { %1693 = vperm.xlu0 %2858, %v1647_v16  }
 0x27b   : > { %v3708_v15 = vpop.permute.xlu1 %2198 }
 0x27f   : > { %v3710_v4 = vpop.permute.xlu1 %2383 }
 0x283   : > { %v3712_v17 = vpop.permute.xlu1 %2208 }
 0x287   : > { %v3714_v53 = vpop.permute.xlu1 %2213 }
 0x28b   : > { %v2181_v25 = vpop.permute.xlu1 %2180 }
 0x28c   : > { %v2192_v59 = vmul.f32 %v3625_v24, %v2181_v25 }
 0x28d   : > { %v2185_v54 = vpop.permute.xlu0 %2184 }
 0x28e   : > { %2226 = vperm.xlu0 %2858, %v2192_v59   ;;  %v2194_v1 = vmul.f32 %v3642_v10, %v2185_v54 }
 0x28f   : > { %v2183_v37 = vpop.permute.xlu1 %2182 }
 0x290   : > { %v2193_v16 = vmul.f32 %v3620_v18, %v2183_v37 }
 0x291   : > { %v2370_v61 = vpop.permute.xlu0 %2369 }
 0x292   : > { %2231 = vperm.xlu1 %2857, %v2193_v16   ;;  %2411 = vperm.xlu0 %2858, %v2377_v44   ;;  %v2379_v59 = vmul.f32 %v3642_v10, %v2370_v61  ;;  %v3974_v44 = vmov 1  }
 0x293   : > { %v2368_v60 = vpop.permute.xlu1 %2367 }
 0x294   : > { %v2378_v6 = vmul.f32 %v3620_v18, %v2368_v60 }
 0x296   : > { %2416 = vperm.xlu1 %2857, %v2378_v6   ;;  %v935_v6 = vsub.f32 %v3342_v8, %v3664_v30  ;;  %v938_v8 = vsub.f32 %v3362_v28, %v3676_v62 }
 0x297   : > { %v3722_v38 = vpop.permute.xlu1 %2393 }
 0x29a   : > { %2236 = vperm.xlu1 %2857, %v2194_v1  }
 0x29b   : > { %v2187_v25 = vpop.permute.xlu1 %2186 }
 0x29c   : > { %v2195_v24 = vmul.f32 %v3648_v13, %v2187_v25 }
 0x29e   : > { %2241 = vperm.xlu0 %2858, %v2195_v24   ;;  %2421 = vperm.xlu1 %2857, %v2379_v59  }
 0x29f   : > { %v2372_v48 = vpop.permute.xlu1 %2371 }
 0x2a0   : > { %v2380_v37 = vmul.f32 %v3648_v13, %v2372_v48  ;;  %v937_v48 = vsub.f32 %v3354_v20, %v3676_v62 }
 0x2a2   : > { %2426 = vperm.xlu0 %2858, %v2380_v37   ;;  %2860 = vset.pattern.permute.xlu1 %v3973_v57  ;;  %v3738_v60 = vpop.permute.xlu0 %2388  ;;  %v754_v37 = vsub.f32 %v3360_v27, %v3667_v45  ;;  %v756_v27 = vsub.f32 %v3374_v51, %v3673_v34 }
 0x2a3   : > { %2261 = vperm.xlu1 %2860, %v3642_v10   ;;  %v936_v10 = vsub.f32 %v3346_v12, %v3664_v30 }
 0x2a6   : > { %2859 = vset.pattern.permute.xlu0 %v3973_v57  ;;  %v3734_v16 = vpop.permute.xlu1 %2398  ;;  %v751_v57 = vsub.f32 %v3340_v7, %v3671_v52 }
 0x2a7   : > { %2257 = vperm.xlu0 %2859, %v3620_v18   ;;  %2265 = vperm.xlu1 %2860, %v3648_v13   ;;  %v752_v18 = vsub.f32 %v3344_v11, %v3671_v52  ;;  %v753_v52 = vsub.f32 %v3352_v19, %v3667_v45  ;;  %v941_v45 = vsub.f32 %v3384_v35, %v3680_v5 }
 0x2ab   : > { %2861 = vset.pattern.permute.xlu0 %v3974_v44  ;;  %v3736_v54 = vpop.permute.xlu1 %2253 }
 0x2bd   : > { %v762_v13 = vpop.permute.xlu1 %761  ;;  %v946_v1 = vpop.permute.xlu0 %945 }
 0x2be   : > { %v779_v61 = vmul.f32 %v762_v13, %v751_v57  ;;  %v780_v25 = vmul.f32 %v762_v13, %v752_v18  ;;  %v963_v59 = vmul.f32 %v946_v1, %v935_v6  ;;  %v964_v24 = vmul.f32 %v946_v1, %v936_v10 }
 0x2bf   : > { %v942_v1 = vsub.f32 %v3386_v36, %v3680_v5  ;;  %v3976_v5 = vld [vmem:[#allocation5_spill] sm:$0xff] }
 0x2c0   : > { %v803_v12 = vadd.f32 %v3563_v49, %v779_v61  ;;  %v804_v7 = vadd.f32 %v3563_v49, %v780_v25  ;;  %v971_v30 = vadd.f32 %v963_v59, %v3563_v49  ;;  %v972_v11 = vadd.f32 %v964_v24, %v3563_v49 }
 0x2c1   : > { %v951_v20 = vpop.permute.xlu1 %950  ;;  %v767_v28 = vpop.permute.xlu0 %766  ;;  %v755_v49 = vsub.f32 %v3372_v40, %v3673_v34 }
 0x2c2   : > { %v2811_v62 = vpack.c.bf16 %v804_v7, %v803_v12  ;;  %v2815_v44 = vpack.c.bf16 %v972_v11, %v971_v30  ;;  %v965_v6 = vmul.f32 %v951_v20, %v937_v48  ;;  %v966_v10 = vmul.f32 %v951_v20, %v938_v8  ;;  %v3975_v7 = vld [vmem:[#allocation2_spill] sm:$0xff] }
 0x2c3   : > { %v781_v19 = vmul.f32 %v767_v28, %v753_v52  ;;  %v782_v57 = vmul.f32 %v767_v28, %v754_v37  ;;  %v939_v48 = vsub.f32 %v3380_v23, %v3678_v58  ;;  %v940_v36 = vsub.f32 %v3975_v7, %v3678_v58  ;;  %v3977_v58 = vld [vmem:[#allocation3_spill] sm:$0xff] }
 0x2c4   : > { %835 = vst [vmem:[%s3764_s12] sm:$0xff] %v2811_v62  ;;  %1003 = vst [vmem:[%s3764_s12 + $0x8] sm:$0xff] %v2815_v44  ;;  %v973_v18 = vadd.f32 %v965_v6, %v3388_v31  ;;  %v974_v13 = vadd.f32 %v966_v10, %v3388_v31  ;;  %v757_v44 = vsub.f32 %v3977_v58, %v3682_v29  ;;  %v3978_v6 = vld [vmem:[#allocation4_spill] sm:$0xff] }
 0x2c5   : > { %v805_v40 = vadd.f32 %v3388_v31, %v781_v19  ;;  %v806_v61 = vadd.f32 %v3388_v31, %v782_v57  ;;  %v772_v25 = vpop.permute.xlu1 %771  ;;  %v961_v51 = vpop.permute.xlu0 %960  ;;  %v758_v10 = vsub.f32 %v3978_v6, %v3682_v29  ;;  %v3986_v6 = vld [vmem:[#allocation13_spill] sm:$0xff] }
 0x2c6   : > { %v2816_v34 = vpack.c.bf16 %v974_v13, %v973_v18  ;;  %v783_v59 = vmul.f32 %v772_v25, %v755_v49  ;;  %v784_v35 = vmul.f32 %v772_v25, %v756_v27  ;;  %v969_v24 = vmul.f32 %v961_v51, %v941_v45  ;;  %v3980_v25 = vld [vmem:[#allocation9_spill] sm:$0xff] }
 0x2c7   : > { %v2812_v8 = vpack.c.bf16 %v806_v61, %v805_v40  ;;  %v970_v12 = vmul.f32 %v961_v51, %v942_v1  ;;  %v3979_v61 = vld [vmem:[#allocation7_spill] sm:$0xff]  ;;  %v1669_v51 = vsub.f32 %v3980_v25, %v3690_v42 }
 0x2c8   : > { %1004 = vst [vmem:[%s3764_s12 + $0x18] sm:$0xff] %v2816_v34  ;;  %v807_v30 = vadd.f32 %v3976_v5, %v783_v59  ;;  %v808_v31 = vadd.f32 %v3976_v5, %v784_v35  ;;  %v977_v11 = vadd.f32 %v969_v24, %v3567_v22  ;;  %v1668_v29 = vsub.f32 %v3979_v61, %v3690_v42  ;;  %v3981_v24 = vld [vmem:[#allocation10_spill] sm:$0xff]  ;;  %v3984_v42 = vld [vmem:[#allocation8_spill] sm:$0xff] }
 0x2c9   : > { %836 = vst [vmem:[%s3764_s12 + $0x10] sm:$0xff] %v2812_v8  ;;  %v978_v52 = vadd.f32 %v970_v12, %v3567_v22  ;;  %v956_v37 = vpop.permute.xlu1 %955  ;;  %v3982_v8 = vld [vmem:[#allocation11_spill] sm:$0xff] }
 0x2ca   : > { %v2813_v23 = vpack.c.bf16 %v808_v31, %v807_v30  ;;  %v967_v20 = vmul.f32 %v956_v37, %v939_v48  ;;  %v968_v28 = vmul.f32 %v956_v37, %v940_v36  ;;  %v1485_v48 = vsub.f32 %v3981_v24, %v3692_v46  ;;  %v3983_v36 = vld [vmem:[#allocation6_spill] sm:$0xff] }
 0x2cb   : > { %v2818_v62 = vpack.c.bf16 %v978_v52, %v977_v11  ;;  %v1486_v12 = vsub.f32 %v3982_v8, %v3692_v46  ;;  %v1484_v31 = vsub.f32 %v3984_v42, %v3688_v63  ;;  %v1674_v42 = vsub.f32 %v3461_v43, %v3703_v47  ;;  %v3989_v43 = vld [vmem:[#allocation16_spill] sm:$0xff] }
 0x2cc   : > { %837 = vst [vmem:[%s3764_s12 + $0x20] sm:$0xff] %v2813_v23  ;;  %v975_v49 = vadd.f32 %v967_v20, %v3976_v5  ;;  %v976_v19 = vadd.f32 %v968_v28, %v3976_v5  ;;  %v1483_v5 = vsub.f32 %v3983_v36, %v3688_v63  ;;  %v3985_v23 = vld [vmem:[#allocation12_spill] sm:$0xff]  ;;  %v3987_v63 = vld [vmem:[#allocation14_spill] sm:$0xff] }
 0x2cd   : > { %1006 = vst [vmem:[%s3764_s12 + $0x38] sm:$0xff] %v2818_v62  ;;  %v777_v57 = vpop.permute.xlu1 %776  ;;  %v1670_v20 = vsub.f32 %v3985_v23, %v3694_v0 }
 0x2ce   : > { %v2817_v27 = vpack.c.bf16 %v976_v19, %v975_v49  ;;  %v785_v45 = vmul.f32 %v777_v57, %v757_v44  ;;  %v786_v18 = vmul.f32 %v777_v57, %v758_v10  ;;  %v1671_v10 = vsub.f32 %v3986_v6, %v3694_v0  ;;  %v3988_v19 = vld [vmem:[#allocation15_spill] sm:$0xff] }
 0x2cf   : > { %v1487_v49 = vsub.f32 %v3987_v63, %v3696_v39  ;;  %v1488_v57 = vsub.f32 %v3988_v19, %v3696_v39  ;;  %v3992_v63 = vld [vmem:[#allocation19_spill] sm:$0xff] }
 0x2d0   : > { %1005 = vst [vmem:[%s3764_s12 + $0x28] sm:$0xff] %v2817_v27  ;;  %v809_v13 = vadd.f32 %v3567_v22, %v785_v45  ;;  %v810_v1 = vadd.f32 %v3567_v22, %v786_v18 }
 0x2d2   : > { %v2814_v40 = vpack.c.bf16 %v810_v1, %v809_v13 }
 0x2d4   : > { %838 = vst [vmem:[%s3764_s12 + $0x30] sm:$0xff] %v2814_v40 }
 0x2e1   : > { %v1679_v34 = vpop.permute.xlu0 %1678 }
 0x2e2   : > { %v1696_v59 = vmul.f32 %v1679_v34, %v1668_v29  ;;  %v1697_v35 = vmul.f32 %v1679_v34, %v1669_v51  ;;  %v1672_v34 = vsub.f32 %v3465_v33, %v3700_v3  ;;  %v1490_v33 = vsub.f32 %v3479_v9, %v3698_v55 }
 0x2e4   : > { %v1704_v22 = vadd.f32 %v1696_v59, %v3565_v26  ;;  %v1705_v7 = vadd.f32 %v1697_v35, %v3565_v26  ;;  %v1673_v59 = vsub.f32 %v3471_v56, %v3700_v3 }
 0x2e5   : > { %v1499_v30 = vpop.permute.xlu0 %1498 }
 0x2e6   : > { %v2823_v11 = vpack.c.bf16 %v1705_v7, %v1704_v22  ;;  %v1513_v52 = vmul.f32 %v1499_v30, %v1485_v48  ;;  %v1514_v37 = vmul.f32 %v1499_v30, %v1486_v12 }
 0x2e8   : > { %v1494_v28 = vpop.permute.xlu1 %1493  ;;  %2710 = vst [vmem:[%s3764_s12 + $0x48] sm:$0xff] %v2823_v11  ;;  %v1537_v46 = vadd.f32 %v3569_v50, %v1513_v52  ;;  %v1538_v62 = vadd.f32 %v3569_v50, %v1514_v37 }
 0x2e9   : > { %v1511_v58 = vmul.f32 %v1494_v28, %v1483_v5  ;;  %v1512_v44 = vmul.f32 %v1494_v28, %v1484_v31  ;;  %v1684_v27 = vpop.permute.xlu0 %1683 }
 0x2ea   : > { %v2820_v45 = vpack.c.bf16 %v1538_v62, %v1537_v46  ;;  %v1698_v1 = vmul.f32 %v1684_v27, %v1670_v20  ;;  %v1699_v40 = vmul.f32 %v1684_v27, %v1671_v10 }
 0x2eb   : > { %v1535_v18 = vadd.f32 %v3565_v26, %v1511_v58  ;;  %v1536_v13 = vadd.f32 %v3565_v26, %v1512_v44  ;;  %v3991_v44 = vld [vmem:[#allocation17_spill] sm:$0xff] }
 0x2ec   : > { %v1504_v61 = vpop.permute.xlu1 %1503  ;;  %2703 = vst [vmem:[%s3764_s12 + $0x50] sm:$0xff] %v2820_v45  ;;  %v1706_v0 = vadd.f32 %v1698_v1, %v3569_v50  ;;  %v1707_v39 = vadd.f32 %v1699_v40, %v3569_v50  ;;  %v1489_v50 = vsub.f32 %v3477_v41, %v3698_v55  ;;  %v1675_v41 = vsub.f32 %v3463_v32, %v3703_v47  ;;  %v3990_v47 = vld [vmem:[#allocation18_spill] sm:$0xff] }
 0x2ed   : > { %v2819_v29 = vpack.c.bf16 %v1536_v13, %v1535_v18  ;;  %v1515_v25 = vmul.f32 %v1504_v61, %v1487_v49  ;;  %v1516_v51 = vmul.f32 %v1504_v61, %v1488_v57  ;;  %v2216_v32 = vsub.f32 %v3989_v43, %v3708_v15 }
 0x2ee   : > { %v2824_v24 = vpack.c.bf16 %v1707_v39, %v1706_v0  ;;  %v2217_v28 = vsub.f32 %v3990_v47, %v3708_v15  ;;  %v2401_v6 = vsub.f32 %v3991_v44, %v3710_v4  ;;  %v2402_v49 = vsub.f32 %v3992_v63, %v3710_v4  ;;  %v3994_v4 = vld [vmem:[#allocation26_spill] sm:$0xff] }
 0x2ef   : > { %2702 = vst [vmem:[%s3764_s12 + $0x40] sm:$0xff] %v2819_v29  ;;  %v1539_v26 = vadd.f32 %v3571_v21, %v1515_v25  ;;  %v1540_v35 = vadd.f32 %v3571_v21, %v1516_v51  ;;  %v3993_v25 = vld [vmem:[#allocation24_spill] sm:$0xff]  ;;  %v2221_v39 = vsub.f32 %v3994_v4, %v3712_v17 }
 0x2f0   : > { %v1689_v48 = vpop.permute.xlu1 %1688  ;;  %2711 = vst [vmem:[%s3764_s12 + $0x58] sm:$0xff] %v2824_v24  ;;  %v2220_v51 = vsub.f32 %v3993_v25, %v3712_v17 }
 0x2f1   : > { %v2821_v8 = vpack.c.bf16 %v1540_v35, %v1539_v26  ;;  %v1700_v12 = vmul.f32 %v1689_v48, %v1672_v34  ;;  %v1701_v22 = vmul.f32 %v1689_v48, %v1673_v59  ;;  %v3995_v34 = vld [vmem:[#allocation25_spill] sm:$0xff]  ;;  %v3996_v26 = vld [vmem:[#allocation27_spill] sm:$0xff] }
 0x2f2   : > { %v2405_v59 = vsub.f32 %v3995_v34, %v3722_v38  ;;  %v2406_v35 = vsub.f32 %v3996_v26, %v3722_v38  ;;  %v3998_v48 = vld [vmem:[#allocation21_spill] sm:$0xff] }
 0x2f3   : > { %2704 = vst [vmem:[%s3764_s12 + $0x60] sm:$0xff] %v2821_v8  ;;  %v1708_v56 = vadd.f32 %v1700_v12, %v3571_v21  ;;  %v1709_v3 = vadd.f32 %v1701_v22, %v3571_v21  ;;  %v2219_v8 = vsub.f32 %v3998_v48, %v3716_v2 }
 0x2f4   : > { %v1509_v7 = vpop.permute.xlu0 %1508 }
 0x2f5   : > { %v2825_v36 = vpack.c.bf16 %v1709_v3, %v1708_v56  ;;  %v1517_v5 = vmul.f32 %v1509_v7, %v1489_v50  ;;  %v1518_v30 = vmul.f32 %v1509_v7, %v1490_v33  ;;  %v3999_v3 = vld [vmem:[#allocation28_spill] sm:$0xff]  ;;  %v4000_v7 = vld [vmem:[#allocation29_spill] sm:$0xff] }
 0x2f6   : > { %v2222_v17 = vsub.f32 %v3999_v3, %v3714_v53 }
 0x2f7   : > { %2712 = vst [vmem:[%s3764_s12 + $0x68] sm:$0xff] %v2825_v36  ;;  %v1541_v9 = vadd.f32 %v3573_v14, %v1517_v5  ;;  %v1542_v55 = vadd.f32 %v3573_v14, %v1518_v30  ;;  %v2223_v36 = vsub.f32 %v4000_v7, %v3714_v53  ;;  %v4001_v5 = vld [vmem:[#allocation30_spill] sm:$0xff]  ;;  %v4002_v30 = vld [vmem:[#allocation31_spill] sm:$0xff] }
 0x2f8   : > { %v1694_v31 = vpop.permute.xlu0 %1693  ;;  %v2407_v38 = vsub.f32 %v4001_v5, %v3734_v16 }
 0x2f9   : > { %v2822_v11 = vpack.c.bf16 %v1542_v55, %v1541_v9  ;;  %v1702_v52 = vmul.f32 %v1694_v31, %v1674_v42  ;;  %v1703_v21 = vmul.f32 %v1694_v31, %v1675_v41  ;;  %v2408_v42 = vsub.f32 %v4002_v30, %v3734_v16 }
 0x2fb   : > { %2705 = vst [vmem:[%s3764_s12 + $0x70] sm:$0xff] %v2822_v11  ;;  %v1710_v37 = vadd.f32 %v1702_v52, %v3573_v14  ;;  %v1711_v23 = vadd.f32 %v1703_v21, %v3573_v14  ;;  %v4003_v11 = vld [vmem:[#allocation22_spill] sm:$0xff]  ;;  %v4004_v21 = vld [vmem:[#allocation23_spill] sm:$0xff] }
 0x2fc   : > { %v2403_v52 = vsub.f32 %v4003_v11, %v3738_v60 }
 0x2fd   : > { %v2826_v20 = vpack.c.bf16 %v1711_v23, %v1710_v37  ;;  %v2404_v37 = vsub.f32 %v4004_v21, %v3738_v60 }
 0x2ff   : > { %2713 = vst [vmem:[%s3764_s12 + $0x78] sm:$0xff] %v2826_v20 }
 0x30d   : > { %v2227_v46 = vpop.permute.xlu0 %2226 }
 0x30e   : > { %v2244_v62 = vmul.f32 %v2227_v46, %v2216_v32  ;;  %v2245_v58 = vmul.f32 %v2227_v46, %v2217_v28 }
 0x310   : > { %v2268_v10 = vadd.f32 %v3736_v54, %v2244_v62  ;;  %v2269_v14 = vadd.f32 %v3736_v54, %v2245_v58 }
 0x311   : > { %v2232_v19 = vpop.permute.xlu1 %2231  ;;  %v2412_v57 = vpop.permute.xlu0 %2411 }
 0x312   : > { %v2827_v27 = vpack.c.bf16 %v2269_v14, %v2268_v10  ;;  %v2429_v45 = vmul.f32 %v2412_v57, %v2401_v6  ;;  %v2430_v18 = vmul.f32 %v2412_v57, %v2402_v49  ;;  %v2247_v28 = vmul.f32 %v2232_v19, %v2219_v8 }
 0x314   : > { %2793 = vst [vmem:[%s3764_s12 + $0x80] sm:$0xff] %v2827_v27  ;;  %v2437_v15 = vadd.f32 %v2429_v45, %v3736_v54  ;;  %v2438_v13 = vadd.f32 %v2430_v18, %v3736_v54  ;;  %v3997_v54 = vld [vmem:[#allocation20_spill] sm:$0xff] }
 0x315   : > { %v2417_v1 = vpop.permute.xlu1 %2416  ;;  %v2218_v24 = vsub.f32 %v3997_v54, %v3716_v2 }
 0x316   : > { %v2831_v40 = vpack.c.bf16 %v2438_v13, %v2437_v15  ;;  %v2431_v46 = vmul.f32 %v2417_v1, %v2403_v52  ;;  %v2432_v62 = vmul.f32 %v2417_v1, %v2404_v37 }
 0x317   : > { %v2246_v16 = vmul.f32 %v2232_v19, %v2218_v24 }
 0x318   : > { %2801 = vst [vmem:[%s3764_s12 + $0x88] sm:$0xff] %v2831_v40 }
 0x319   : > { %v2237_v61 = vpop.permute.xlu1 %2236 }
 0x31a   : > { %v2248_v12 = vmul.f32 %v2237_v61, %v2220_v51  ;;  %v2249_v22 = vmul.f32 %v2237_v61, %v2221_v39 }
 0x31d   : > { %v2422_v29 = vpop.permute.xlu1 %2421  ;;  %v2242_v0 = vpop.permute.xlu0 %2241 }
 0x31e   : > { %v2433_v50 = vmul.f32 %v2422_v29, %v2405_v59  ;;  %v2434_v33 = vmul.f32 %v2422_v29, %v2406_v35  ;;  %v2250_v53 = vmul.f32 %v2242_v0, %v2222_v17  ;;  %v2251_v23 = vmul.f32 %v2242_v0, %v2223_v36 }
 0x321   : > { %v2427_v56 = vpop.permute.xlu0 %2426 }
 0x322   : > { %v2262_v41 = vpop.permute.xlu1 %2261  ;;  %v2435_v20 = vmul.f32 %v2427_v56, %v2407_v38  ;;  %v2436_v43 = vmul.f32 %v2427_v56, %v2408_v42 }
 0x323   : > { %v2272_v9 = vadd.f32 %v2262_v41, %v2248_v12  ;;  %v2273_v2 = vadd.f32 %v2262_v41, %v2249_v22  ;;  %v2441_v55 = vadd.f32 %v2433_v50, %v2262_v41  ;;  %v2442_v31 = vadd.f32 %v2434_v33, %v2262_v41 }
 0x325   : > { %v2829_v32 = vpack.c.bf16 %v2273_v2, %v2272_v9  ;;  %v2833_v47 = vpack.c.bf16 %v2442_v31, %v2441_v55 }
 0x326   : > { %v2266_v58 = vpop.permute.xlu1 %2265  ;;  %v2258_v44 = vpop.permute.xlu0 %2257 }
 0x327   : > { %2795 = vst [vmem:[%s3764_s12 + $0xa0] sm:$0xff] %v2829_v32  ;;  %2803 = vst [vmem:[%s3764_s12 + $0xa8] sm:$0xff] %v2833_v47  ;;  %v2274_v6 = vadd.f32 %v2266_v58, %v2250_v53  ;;  %v2275_v60 = vadd.f32 %v2266_v58, %v2251_v23  ;;  %v2443_v10 = vadd.f32 %v2435_v20, %v2266_v58 }
 0x328   : > { %v2444_v14 = vadd.f32 %v2436_v43, %v2266_v58  ;;  %v2270_v63 = vadd.f32 %v2258_v44, %v2246_v16  ;;  %v2271_v49 = vadd.f32 %v2258_v44, %v2247_v28  ;;  %v2439_v57 = vadd.f32 %v2431_v46, %v2258_v44 }
 0x329   : > { %v2440_v27 = vadd.f32 %v2432_v62, %v2258_v44  ;;  %v2830_v45 = vpack.c.bf16 %v2275_v60, %v2274_v6 }
 0x32a   : > { %v2834_v19 = vpack.c.bf16 %v2444_v14, %v2443_v10  ;;  %v2828_v18 = vpack.c.bf16 %v2271_v49, %v2270_v63 }
 0x32b   : > { %v2832_v15 = vpack.c.bf16 %v2440_v27, %v2439_v57  ;;  %2796 = vst [vmem:[%s3764_s12 + $0xb0] sm:$0xff] %v2830_v45 }
 0x32c   : > { %2804 = vst [vmem:[%s3764_s12 + $0xb8] sm:$0xff] %v2834_v19  ;;  %2794 = vst [vmem:[%s3764_s12 + $0x90] sm:$0xff] %v2828_v18 }
 0x32d   : > { %2802 = vst [vmem:[%s3764_s12 + $0x98] sm:$0xff] %v2832_v15 }
 0x32e PF: > { %s14_s15 = sadd.s32 1, %s3078_s15  }
 0x32f   : > { %p11_p4 = scmp.ge.s32.totalorder %s14_s15, 4  }
 0x331   :  { %13 = sbr.rel (!%p11_p4) target bundleno = 1 (0x1), region = 85 }

</bundles_post_ra>
